<compile_context>
chip_gen: v7x
topology: tpu7x:2x2x1
jax: 0.10.0
libtpu: 0.0.40
codegen_flags: <defaults>
</compile_context>

<pallas_src>
import numpy as np
import jax
import jax.numpy as jnp
from jax.experimental import pallas as pl
from jax.experimental.pallas import tpu as pltpu

# ---- model dimensions implied by the PyTorch module (MFCC input: N x 5 x 13 x 3, NCHW) ----
IN_CH = 5
C1 = 32                        # conv1 out channels
C2 = 64                        # conv2 out channels (otuput_size=64)
H_IN, W_IN = 13, 3             # conv1 -> (12, 2), conv2 -> (11, 1), MaxPool2d((11,1)) -> (1, 1)
H1, W1S = H_IN - 1, W_IN - 1   # 12, 2
H2 = H1 - 1                    # 11
FEAT_IN = H_IN * W_IN * IN_CH  # 195   input lane = h*15 + w*5 + c
FEAT_PAD = 256                 # K padded to a clean multiple of 128/256 for matmul-1
D1 = H1 * W1S * C1             # 768   conv1 lane = (h1*2 + w1)*32 + o
D2 = H2 * C2                   # 704   conv2 lane = h2*64 + o2

TILE_B = 1024                  # max batch rows per grid step


# ------------------------------------------------------------------ Pallas kernel
def cnn_kernel(x_ref, w1_ref, b1_ref, w2_ref, b2_ref, out_ref):
    x = x_ref[...]                                                   # (TB, 256) bf16
    # conv1 (all 12x2 output positions at once), bf16 operands, f32 accum, bias+ReLU in f32
    y1 = jnp.dot(x, w1_ref[...], preferred_element_type=jnp.float32)
    y1 = jnp.maximum(y1 + b1_ref[...], 0.0)                          # (TB, 768) f32
    # conv2 (all 11 output rows at once), bf16 operands, f32 accum, bias+ReLU in f32
    y2 = jnp.dot(y1.astype(jnp.bfloat16), w2_ref[...],
                 preferred_element_type=jnp.float32)
    y2 = jnp.maximum(y2 + b2_ref[...], 0.0)                          # (TB, 704) f32
    # MaxPool2d((11,1)) + Flatten: pairwise tree-max over the 11 static 64-lane blocks
    blocks = [y2[:, h * C2:(h + 1) * C2] for h in range(H2)]
    while len(blocks) > 1:
        nxt = [jnp.maximum(blocks[i], blocks[i + 1])
               for i in range(0, len(blocks) - 1, 2)]
        if len(blocks) % 2:
            nxt.append(blocks[-1])
        blocks = nxt
    out_ref[...] = blocks[0]                                         # (TB, 64) f32


# ------------------------------------------------------------------ one-time host-side weight repacking
def pack_params(p):
    """Build the dense matmul slabs once on the host (numpy), return device arrays."""
    w1 = np.asarray(p["conv1_w"], np.float32)   # (32, 5, 2, 2)  OIHW
    b1 = np.asarray(p["conv1_b"], np.float32)
    w2 = np.asarray(p["conv2_w"], np.float32)   # (64, 32, 2, 2)
    b2 = np.asarray(p["conv2_b"], np.float32)

    # conv1 as a dense (256, 768) matmul (rows 195..255 are zero padding).
    # m_dh[dw*5 + c, o] = w1[o, c, dh, dw]
    m_dh = [np.transpose(w1[:, :, dh, :], (2, 1, 0)).reshape(2 * IN_CH, C1) for dh in range(2)]
    w1d = np.zeros((FEAT_PAD, D1), np.float32)
    for h1 in range(H1):
        for wp in range(W1S):
            col = (h1 * W1S + wp) * C1
            for dh in range(2):
                row = (h1 + dh) * (W_IN * IN_CH) + wp * IN_CH
                w1d[row:row + 2 * IN_CH, col:col + C1] = m_dh[dh]
    b1d = np.tile(b1, H1 * W1S)[None, :]                             # (1, 768)

    # conv2 as a dense (768, 704) matmul.
    # b_dh[dw*32 + c1, o2] = w2[o2, c1, dh, dw]
    b_dh = [np.transpose(w2[:, :, dh, :], (2, 1, 0)).reshape(2 * C1, C2) for dh in range(2)]
    w2d = np.zeros((D1, D2), np.float32)
    for h2 in range(H2):
        col = h2 * C2
        for dh in range(2):
            row = (h2 + dh) * (W1S * C1)
            w2d[row:row + 2 * C1, col:col + C2] = b_dh[dh]
    b2d = np.tile(b2, H2)[None, :]                                   # (1, 704)

    return (jnp.asarray(w1d, jnp.bfloat16), jnp.asarray(b1d, jnp.float32),
            jnp.asarray(w2d, jnp.bfloat16), jnp.asarray(b2d, jnp.float32))


# ------------------------------------------------------------------ wrapper
def forward(x, w1d, b1d, w2d, b2d):
    n = x.shape[0]
    # NCHW (N,5,13,3) -> (N,13,3,5) -> (N,195) -> zero-pad K to 256, cast to bf16.
    xr = jnp.transpose(x.astype(jnp.float32), (0, 2, 3, 1)).reshape(n, FEAT_IN)
    xr = jnp.pad(xr, ((0, 0), (0, FEAT_PAD - FEAT_IN))).astype(jnp.bfloat16)

    # Adaptive batch tile: >= 2 grid steps when the batch allows it (keeps both v7x TCs busy),
    # capped at TILE_B, rounded to the 8-sublane granule.
    half = (n + 1) // 2
    tile_b = min(TILE_B, max(8, ((half + 7) // 8) * 8))
    n_pad = ((n + tile_b - 1) // tile_b) * tile_b
    if n_pad != n:
        xr = jnp.pad(xr, ((0, n_pad - n), (0, 0)))

    out = pl.pallas_call(
        cnn_kernel,
        out_shape=jax.ShapeDtypeStruct((n_pad, C2), jnp.float32),
        grid=(n_pad // tile_b,),
        in_specs=[
            pl.BlockSpec((tile_b, FEAT_PAD), lambda i: (i, 0)),    # batch tile of inputs (bf16)
            pl.BlockSpec((FEAT_PAD, D1), lambda i: (0, 0)),        # conv1 weight slab (resident)
            pl.BlockSpec((1, D1), lambda i: (0, 0)),               # conv1 bias (f32)
            pl.BlockSpec((D1, D2), lambda i: (0, 0)),              # conv2 weight slab (resident)
            pl.BlockSpec((1, D2), lambda i: (0, 0)),               # conv2 bias (f32)
        ],
        out_specs=pl.BlockSpec((tile_b, C2), lambda i: (i, 0)),    # dense (tile_b, 64) store
        compiler_params=pltpu.CompilerParams(
            dimension_semantics=("parallel",),                     # shard batch tiles across TCs
            vmem_limit_bytes=48 * 1024 * 1024,                     # explicit; < v7x 64 MiB phys
        ),
    )(xr, w1d, b1d, w2d, b2d)
    return out[:n]


forward_jit = jax.jit(forward)


# ------------------------------------------------------------------ deterministic parameters
def init_params(key):
    ks = jax.random.split(key, 4)
    s = 0.1
    return dict(
        conv1_w=jax.random.normal(ks[0], (C1, IN_CH, 2, 2), jnp.float32) * s,
        conv1_b=jax.random.normal(ks[1], (C1,), jnp.float32) * s,
        conv2_w=jax.random.normal(ks[2], (C2, C1, 2, 2), jnp.float32) * s,
        conv2_b=jax.random.normal(ks[3], (C2,), jnp.float32) * s,
    )


# ------------------------------------------------------------------ pure-JAX reference (for checking)
def reference(x, p):
    dn = ("NCHW", "OIHW", "NCHW")
    y = jax.lax.conv_general_dilated(x, p["conv1_w"], (1, 1), "VALID", dimension_numbers=dn)
    y = jax.nn.relu(y + p["conv1_b"][None, :, None, None])
    y = jax.lax.conv_general_dilated(y, p["conv2_w"], (1, 1), "VALID", dimension_numbers=dn)
    y = jax.nn.relu(y + p["conv2_b"][None, :, None, None])
    y = jax.lax.reduce_window(y, -jnp.inf, jax.lax.max, (1, 1, H2, 1), (1, 1, H2, 1), "VALID")
    return y.reshape(y.shape[0], -1)                               # (N, 64)


if __name__ == "__main__":
    key = jax.random.PRNGKey(0)
    kx, kp = jax.random.split(key)
    batch = 32
    mfcc = jax.random.normal(kx, (batch, IN_CH, H_IN, W_IN), jnp.float32)   # NCHW, as in PyTorch
    params = init_params(kp)

    # Pack the weight slabs ONCE (host-side), outside the call path.
    packed = pack_params(params)

    out = jax.block_until_ready(forward_jit(mfcc, *packed))
    assert out.shape == (batch, C2), out.shape

    ref = jax.block_until_ready(reference(mfcc, params))
    if not jnp.allclose(out, ref, rtol=2e-2, atol=2e-2):
        raise AssertionError(f"mismatch: max abs diff {jnp.max(jnp.abs(out - ref))}")

    print("KERNEL_OK")
</pallas_src>

<mosaic_0001>
module attributes {stable_mosaic.version = 11 : i64} {
  func.func @cnn_kernel(%arg0: i32, %arg1: memref<16x256xbf16, #tpu.memory_space<vmem>>, %arg2: memref<256x768xbf16, #tpu.memory_space<vmem>>, %arg3: memref<1x768xf32, #tpu.memory_space<vmem>>, %arg4: memref<768x704xbf16, #tpu.memory_space<vmem>>, %arg5: memref<1x704xf32, #tpu.memory_space<vmem>>, %arg6: memref<16x64xf32, #tpu.memory_space<vmem>>) attributes {dimension_semantics = [#tpu.dimension_semantics<parallel>], iteration_bounds = array<i64: 2>, scalar_prefetch = 0 : i64, scratch_operands = 0 : i64, tpu.core_type = #tpu.core_type<tc>, window_params = [{transform_indices = @transform_0, window_bounds = array<i64: 16, 256>}, {pipeline_mode = #tpu.pipeline_mode<synchronous>, transform_indices = @transform_1, window_bounds = array<i64: 256, 768>}, {pipeline_mode = #tpu.pipeline_mode<synchronous>, transform_indices = @transform_2, window_bounds = array<i64: 1, 768>}, {pipeline_mode = #tpu.pipeline_mode<synchronous>, transform_indices = @transform_3, window_bounds = array<i64: 768, 704>}, {pipeline_mode = #tpu.pipeline_mode<synchronous>, transform_indices = @transform_4, window_bounds = array<i64: 1, 704>}, {transform_indices = @transform_5, window_bounds = array<i64: 16, 64>}]} {
    %c0 = arith.constant 0 : index
    %c0_0 = arith.constant 0 : index
    %0 = vector.load %arg1[%c0, %c0_0] : memref<16x256xbf16, #tpu.memory_space<vmem>>, vector<16x256xbf16>
    %c0_1 = arith.constant 0 : index
    %c0_2 = arith.constant 0 : index
    %1 = vector.load %arg2[%c0_1, %c0_2] : memref<256x768xbf16, #tpu.memory_space<vmem>>, vector<256x768xbf16>
    %cst = arith.constant dense<0.000000e+00> : vector<16x768xf32>
    %2 = tpu.matmul %0, %1, %cst {dimension_numbers = #tpu.dot_dimension_numbers<[1], [0], [0], [1], [0, 0, 1, 1], [], []>} : vector<16x256xbf16>, vector<256x768xbf16>, vector<16x768xf32> -> vector<16x768xf32>
    %c0_3 = arith.constant 0 : index
    %c0_4 = arith.constant 0 : index
    %3 = vector.load %arg3[%c0_3, %c0_4] : memref<1x768xf32, #tpu.memory_space<vmem>>, vector<1x768xf32>
    %4 = vector.broadcast %3 : vector<1x768xf32> to vector<16x768xf32>
    %5 = arith.addf %2, %4 : vector<16x768xf32>
    %cst_5 = arith.constant 0.000000e+00 : f32
    %6 = vector.broadcast %cst_5 : f32 to vector<16x768xf32>
    %7 = arith.maximumf %5, %6 : vector<16x768xf32>
    %8 = arith.truncf %7 : vector<16x768xf32> to vector<16x768xbf16>
    %c0_6 = arith.constant 0 : index
    %c0_7 = arith.constant 0 : index
    %9 = vector.load %arg4[%c0_6, %c0_7] : memref<768x704xbf16, #tpu.memory_space<vmem>>, vector<768x704xbf16>
    %cst_8 = arith.constant dense<0.000000e+00> : vector<16x704xf32>
    %10 = tpu.matmul %8, %9, %cst_8 {dimension_numbers = #tpu.dot_dimension_numbers<[1], [0], [0], [1], [0, 0, 1, 1], [], []>} : vector<16x768xbf16>, vector<768x704xbf16>, vector<16x704xf32> -> vector<16x704xf32>
    %c0_9 = arith.constant 0 : index
    %c0_10 = arith.constant 0 : index
    %11 = vector.load %arg5[%c0_9, %c0_10] : memref<1x704xf32, #tpu.memory_space<vmem>>, vector<1x704xf32>
    %12 = vector.broadcast %11 : vector<1x704xf32> to vector<16x704xf32>
    %13 = arith.addf %10, %12 : vector<16x704xf32>
    %cst_11 = arith.constant 0.000000e+00 : f32
    %14 = vector.broadcast %cst_11 : f32 to vector<16x704xf32>
    %15 = arith.maximumf %13, %14 : vector<16x704xf32>
    %16 = vector.extract_strided_slice %15 {offsets = [0, 0], sizes = [16, 64], strides = [1, 1]} : vector<16x704xf32> to vector<16x64xf32>
    %17 = vector.extract_strided_slice %15 {offsets = [0, 64], sizes = [16, 64], strides = [1, 1]} : vector<16x704xf32> to vector<16x64xf32>
    %18 = vector.extract_strided_slice %15 {offsets = [0, 128], sizes = [16, 64], strides = [1, 1]} : vector<16x704xf32> to vector<16x64xf32>
    %19 = vector.extract_strided_slice %15 {offsets = [0, 192], sizes = [16, 64], strides = [1, 1]} : vector<16x704xf32> to vector<16x64xf32>
    %20 = vector.extract_strided_slice %15 {offsets = [0, 256], sizes = [16, 64], strides = [1, 1]} : vector<16x704xf32> to vector<16x64xf32>
    %21 = vector.extract_strided_slice %15 {offsets = [0, 320], sizes = [16, 64], strides = [1, 1]} : vector<16x704xf32> to vector<16x64xf32>
    %22 = vector.extract_strided_slice %15 {offsets = [0, 384], sizes = [16, 64], strides = [1, 1]} : vector<16x704xf32> to vector<16x64xf32>
    %23 = vector.extract_strided_slice %15 {offsets = [0, 448], sizes = [16, 64], strides = [1, 1]} : vector<16x704xf32> to vector<16x64xf32>
    %24 = vector.extract_strided_slice %15 {offsets = [0, 512], sizes = [16, 64], strides = [1, 1]} : vector<16x704xf32> to vector<16x64xf32>
    %25 = vector.extract_strided_slice %15 {offsets = [0, 576], sizes = [16, 64], strides = [1, 1]} : vector<16x704xf32> to vector<16x64xf32>
    %26 = vector.extract_strided_slice %15 {offsets = [0, 640], sizes = [16, 64], strides = [1, 1]} : vector<16x704xf32> to vector<16x64xf32>
    %27 = arith.maximumf %16, %17 : vector<16x64xf32>
    %28 = arith.maximumf %18, %19 : vector<16x64xf32>
    %29 = arith.maximumf %20, %21 : vector<16x64xf32>
    %30 = arith.maximumf %22, %23 : vector<16x64xf32>
    %31 = arith.maximumf %24, %25 : vector<16x64xf32>
    %32 = arith.maximumf %27, %28 : vector<16x64xf32>
    %33 = arith.maximumf %29, %30 : vector<16x64xf32>
    %34 = arith.maximumf %31, %26 : vector<16x64xf32>
    %35 = arith.maximumf %32, %33 : vector<16x64xf32>
    %36 = arith.maximumf %35, %34 : vector<16x64xf32>
    %c0_12 = arith.constant 0 : index
    %c0_13 = arith.constant 0 : index
    %37 = vector.load %arg6[%c0_12, %c0_13] : memref<16x64xf32, #tpu.memory_space<vmem>>, vector<16x64xf32>
    tpu.vector_store %arg6[%c0_12, %c0_13], %36 {strides = array<i32>} : memref<16x64xf32, #tpu.memory_space<vmem>>, vector<16x64xf32>,
    return
  }
  func.func @transform_0(%arg0: i32) -> (i32, i32) {
    %c0_i32 = arith.constant 0 : i32
    %c0_i32_0 = arith.constant 0 : i32
    return %arg0, %c0_i32 : i32, i32
  }
  func.func @transform_1(%arg0: i32) -> (i32, i32) {
    %c0_i32 = arith.constant 0 : i32
    %c0_i32_0 = arith.constant 0 : i32
    %c0_i32_1 = arith.constant 0 : i32
    return %c0_i32, %c0_i32_0 : i32, i32
  }
  func.func @transform_2(%arg0: i32) -> (i32, i32) {
    %c0_i32 = arith.constant 0 : i32
    %c0_i32_0 = arith.constant 0 : i32
    %c0_i32_1 = arith.constant 0 : i32
    return %c0_i32, %c0_i32_0 : i32, i32
  }
  func.func @transform_3(%arg0: i32) -> (i32, i32) {
    %c0_i32 = arith.constant 0 : i32
    %c0_i32_0 = arith.constant 0 : i32
    %c0_i32_1 = arith.constant 0 : i32
    return %c0_i32, %c0_i32_0 : i32, i32
  }
  func.func @transform_4(%arg0: i32) -> (i32, i32) {
    %c0_i32 = arith.constant 0 : i32
    %c0_i32_0 = arith.constant 0 : i32
    %c0_i32_1 = arith.constant 0 : i32
    return %c0_i32, %c0_i32_0 : i32, i32
  }
  func.func @transform_5(%arg0: i32) -> (i32, i32) {
    %c0_i32 = arith.constant 0 : i32
    %c0_i32_0 = arith.constant 0 : i32
    return %arg0, %c0_i32 : i32, i32
  }
}

</mosaic_0001>

<bundles_post_ra>
// kernel: forward.1
= control target key start
LH: loop header
LB: loop body
LE: loop exit
PB: predicated region body
PF: predicated region fallthrough
CT: control target
= control target key end

     0   :  { %10 = vsyncpa [#allocation3], 0  ;;  %s5798_s0 = inlined_call_operand.vmem [shape: bf16[32,256], index: 0, kind: input, shape index: {}]   ;;  %s5799_s1 = inlined_call_operand.vmem [shape: bf16[256,768], index: 1, kind: input, shape index: {}]   ;;  %s5800_s2 = inlined_call_operand.vmem [shape: f32[1,768], index: 2, kind: input, shape index: {}]   ;;  %s5801_s3 = inlined_call_operand.vmem [shape: bf16[768,704], index: 3, kind: input, shape index: {}]   ;;  %s5802_s4 = inlined_call_operand.vmem [shape: f32[1,704], index: 4, kind: input, shape index: {}]   ;;  %s5803_s5 = inlined_call_operand.hbm [shape: f32[32,64], index: 5, kind: output, shape index: {}]  }
   0x1   :  { %12 = vsyncpa [#allocation3 + $0x1], 0  ;;  %s4450_s18 = smov 0   ;;  %s4452_s19 = smov 0  }
   0x2   :  { %s4454_s20 = smov 0   ;;  %s4456_s21 = smov 0  }
   0x3 LB: > { %s4471_s22 = sadd.s32 4294967295, %s4414_s21   ;;  %s3294_s23 = sadd.s32 4294967294, %s4414_s21   ;;  %s4414_s21 = sphi %s4456_s21, %s5809_s21   ;;  %s4410_s20 = sphi %s4454_s20, %s5808_s20   ;;  %s4406_s19 = sphi %s4452_s19, %s5807_s19   ;;  %s4402_s18 = sphi %s4450_s18, %s5806_s18  }
   0x4   : > { %s4475_s24 = sadd.s32 1, %s4414_s21   ;;  %s135_s25 = sadd.s32 1, %s4410_s20 }
   0x5   : > { %s132_s26 = ssub.s32 %s4414_s21, %s4475_s24  ;;  %p145_p0 = scmp.ne.s32.totalorder %s4410_s20, %s4406_s19 }
   0x6   : > { %p133_p1 = scmp.eq.s32.totalorder %s132_s26, 0  ;;  %p146_p2 = scmp.eq.s32.totalorder %s4471_s22, 1 }
   0x7   : > { %p151_p3 = scmp.ne.s32.totalorder %s4406_s19, %s4402_s18  ;;  %p152_p4 = scmp.eq.s32.totalorder %s3294_s23, 1 }
   0x8   : > { %s4486_s27 = scalar_select %p133_p1, %s4410_s20, %s135_s25  }
   0x9   : > { %p4488_p5 = por %p146_p2, %p145_p0  ;;  %p4492_p6 = por %p152_p4, %p151_p3 }
   0xa   : > { %p3297_p7 = scmp.ge.s32.totalorder %s4414_s21, 1  ;;  %p192_p8 = scmp.lt.s32.totalorder %s4414_s21, 3 }
   0xc   : > { %p193_p9 = pnand %p3297_p7, %p192_p8 }
   0xd   : > { %v3773_v0 = vld [vmem:[%s5799_s1 + $0x4] ss:$24 sps:$4 sm:$0xff] (!%p193_p9)   ;;  %v3775_v1 = vld [vmem:[%s5799_s1] ss:$24 sps:$4 sm:$0xff] (!%p193_p9)   ;;  %v3776_v2 = vld [vmem:[%s5799_s1 + $0x34] ss:$24 sps:$4 sm:$0xff] (!%p193_p9)  }
   0xe   : > { %196 = sbr.rel (%p193_p9) target bundleno = 974 (0x3ce), region = 40  ;;  %849 = vmatprep.subr.bf16.mxu0 (!%p193_p9), %v3773_v0  ;;  %v3778_v3 = vld [vmem:[%s5799_s1 + $0x30] ss:$24 sps:$4 sm:$0xff] (!%p193_p9)   ;;  %v3779_v4 = vld [vmem:[%s5799_s1 + $0x64] ss:$24 sps:$4 sm:$0xff] (!%p193_p9)   ;;  %s3299_s15 = sshll.u32 (!%p193_p9), %s4471_s22, 1 }
   0xf   : > { %850 = vmatpush1.bf16.msra.mxu0 (!%p193_p9), %v3775_v1  ;;  %v3781_v5 = vld [vmem:[%s5799_s1 + $0x60] ss:$24 sps:$4 sm:$0xff] (!%p193_p9)   ;;  %v3782_v6 = vld [vmem:[%s5799_s1 + $0x94] ss:$24 sps:$4 sm:$0xff] (!%p193_p9)   ;;  %p222_p10 = scmp.lt.s32.totalorder (!%p193_p9), %s3299_s15, 3  ;;  %s4416_s17 = smov (!%p193_p9), 64  }
  0x10   : > { %851 = vmatprep.subr.bf16.mxu0 (!%p193_p9), %v3776_v2  ;;  %v3784_v7 = vld [vmem:[%s5799_s1 + $0x90] ss:$24 sps:$4 sm:$0xff] (!%p193_p9)   ;;  %v3785_v8 = vld [vmem:[%s5799_s1 + $0xc4] ss:$24 sps:$4 sm:$0xff] (!%p193_p9)   ;;  %v3787_v9 = vld [vmem:[%s5799_s1 + $0xc0] ss:$24 sps:$4 sm:$0xff] (!%p193_p9)  }
  0x11   : > { %v3788_v10 = vld [vmem:[%s5799_s1 + $0xf4] ss:$24 sps:$4 sm:$0xff] (!%p193_p9)   ;;  %v3790_v11 = vld [vmem:[%s5799_s1 + $0xf0] ss:$24 sps:$4 sm:$0xff] (!%p193_p9)   ;;  %v3791_v12 = vld [vmem:[%s5799_s1 + $0x124] ss:$24 sps:$4 sm:$0xff] (!%p193_p9)  }
  0x12   : > { %v3793_v14 = vld [vmem:[%s5799_s1 + $0x120] ss:$24 sps:$4 sm:$0xff] (!%p193_p9)   ;;  %v3794_v15 = vld [vmem:[%s5799_s1 + $0x154] ss:$24 sps:$4 sm:$0xff] (!%p193_p9)   ;;  %v3796_v16 = vld [vmem:[%s5799_s1 + $0x150] ss:$24 sps:$4 sm:$0xff] (!%p193_p9)  }
  0x13   : > { %852 = vmatpush1.bf16.msra.mxu0 (!%p193_p9), %v3778_v3  ;;  %v3797_v17 = vld [vmem:[%s5799_s1 + $0x184] ss:$24 sps:$4 sm:$0xff] (!%p193_p9)   ;;  %v3799_v18 = vld [vmem:[%s5799_s1 + $0x180] ss:$24 sps:$4 sm:$0xff] (!%p193_p9)   ;;  %v3800_v19 = vld [vmem:[%s5799_s1 + $0x1b4] ss:$24 sps:$4 sm:$0xff] (!%p193_p9)  }
  0x14   : > { %853 = vmatprep.subr.bf16.mxu0 (!%p193_p9), %v3779_v4  ;;  %v3802_v20 = vld [vmem:[%s5799_s1 + $0x1b0] ss:$24 sps:$4 sm:$0xff] (!%p193_p9)   ;;  %v3803_v21 = vld [vmem:[%s5799_s1 + $0x1e4] ss:$24 sps:$4 sm:$0xff] (!%p193_p9)   ;;  %v3805_v22 = vld [vmem:[%s5799_s1 + $0x1e0] ss:$24 sps:$4 sm:$0xff] (!%p193_p9)  }
  0x15   : > { %s5811_s15 = smov (!%p222_p10, %s3299_s15), 3  ;;  %v3806_v23 = vld [vmem:[%s5799_s1 + $0x214] ss:$24 sps:$4 sm:$0xff]   ;;  %v3808_v24 = vld [vmem:[%s5799_s1 + $0x210] ss:$24 sps:$4 sm:$0xff]   ;;  %s218_s25 = sand.u32 1, %s4406_s19  }
  0x16   : > { %s3693_s12 = sshll.u32 %s5811_s15, 3  ;;  %v3809_v25 = vld [vmem:[%s5799_s1 + $0x244] ss:$24 sps:$4 sm:$0xff]   ;;  %v3811_v26 = vld [vmem:[%s5799_s1 + $0x240] ss:$24 sps:$4 sm:$0xff]   ;;  %s3298_s26 = sshll.u32 %s218_s25, 4 }
  0x17   : > { %854 = vmatpush1.bf16.msra.mxu0 %v3781_v5  ;;  %s4538_s23 = scalar_lea.vmem %s5798_s0, %s3693_s12  ;;  %v3812_v27 = vld [vmem:[%s5799_s1 + $0x274] ss:$24 sps:$4 sm:$0xff]   ;;  %v3814_v28 = vld [vmem:[%s5799_s1 + $0x270] ss:$24 sps:$4 sm:$0xff]   ;;  %v3815_v29 = vld [vmem:[%s5799_s1 + $0x2a4] ss:$24 sps:$4 sm:$0xff]  }
  0x18   : > { %855 = vmatprep.subr.bf16.mxu0 %v3782_v6  ;;  %v4544_v13 = vld [vmem:[%s4538_s23 + $0x4] ss:$8 sps:$4 sm:$0xff]   ;;  %v3817_v30 = vld [vmem:[%s5799_s1 + $0x2a0] ss:$24 sps:$4 sm:$0xff]   ;;  %v3820_v32 = vld [vmem:[%s5799_s1 + $0x2d0] ss:$24 sps:$4 sm:$0xff]  }
  0x19   : > { %881 = vmatprep.mubr.bf16.mxu0 %v4544_v13  ;;  %v3818_v31 = vld [vmem:[%s5799_s1 + $0x2d4] ss:$24 sps:$4 sm:$0xff]   ;;  %v4608_v34 = vld [vmem:[%s4538_s23] ss:$8 sps:$4 sm:$0xff]   ;;  %v3920_v37 = vld [vmem:[%s5801_s3 + $0x4] ss:$24 sps:$4 sm:$0xff]  }
  0x1a   : > { %v3826_v33 = vld [vmem:[%s5799_s1 + $0xc] ss:$24 sps:$4 sm:$0xff]   ;;  %v3824_v35 = vld [vmem:[%s5799_s1 + $0x8] ss:$24 sps:$4 sm:$0xff]   ;;  %v3829_v36 = vld [vmem:[%s5799_s1 + $0x3c] ss:$24 sps:$4 sm:$0xff]   ;;  %2756 = vmatprep.subr.bf16.mxu1 %v3920_v37 }
  0x1b   : > { %856 = vmatpush1.bf16.msra.mxu0 %v3784_v7  ;;  %v3922_v38 = vld [vmem:[%s5801_s3] ss:$24 sps:$4 sm:$0xff]   ;;  %v3832_v40 = vld [vmem:[%s5799_s1 + $0x6c] ss:$24 sps:$4 sm:$0xff]   ;;  %v3928_v42 = vld [vmem:[%s5801_s3 + $0x30] ss:$24 sps:$4 sm:$0xff]  }
  0x1c   : > { %857 = vmatprep.subr.bf16.mxu0 %v3785_v8  ;;  %v3827_v39 = vld [vmem:[%s5799_s1 + $0x38] ss:$24 sps:$4 sm:$0xff]   ;;  %v3926_v41 = vld [vmem:[%s5801_s3 + $0x34] ss:$24 sps:$4 sm:$0xff]   ;;  %2757 = vmatpush1.bf16.msra.mxu1 %v3922_v38  ;;  %v3830_v43 = vld [vmem:[%s5799_s1 + $0x68] ss:$24 sps:$4 sm:$0xff]  }
  0x1d   : > { %2758 = vmatprep.subr.bf16.mxu1 %v3926_v41  ;;  %v3932_v44 = vld [vmem:[%s5801_s3 + $0x64] ss:$24 sps:$4 sm:$0xff]   ;;  %v3934_v46 = vld [vmem:[%s5801_s3 + $0x60] ss:$24 sps:$4 sm:$0xff]   ;;  %v3938_v49 = vld [vmem:[%s5801_s3 + $0x94] ss:$24 sps:$4 sm:$0xff]  }
  0x1e   : > { %v3835_v45 = vld [vmem:[%s5799_s1 + $0x9c] ss:$24 sps:$4 sm:$0xff]   ;;  %v3833_v47 = vld [vmem:[%s5799_s1 + $0x98] ss:$24 sps:$4 sm:$0xff]   ;;  %v3838_v48 = vld [vmem:[%s5799_s1 + $0xcc] ss:$24 sps:$4 sm:$0xff]  }
  0x1f   : > { %858 = vmatpush1.bf16.msra.mxu0 %v3787_v9  ;;  %v3940_v50 = vld [vmem:[%s5801_s3 + $0x90] ss:$24 sps:$4 sm:$0xff]   ;;  %v3841_v52 = vld [vmem:[%s5799_s1 + $0xfc] ss:$24 sps:$4 sm:$0xff]   ;;  %v3946_v54 = vld [vmem:[%s5801_s3 + $0xc0] ss:$24 sps:$4 sm:$0xff]  }
  0x20   : > { %859 = vmatprep.subr.bf16.mxu0 %v3788_v10  ;;  %2759 = vmatpush1.bf16.msra.mxu1 %v3928_v42  ;;  %v3836_v51 = vld [vmem:[%s5799_s1 + $0xc8] ss:$24 sps:$4 sm:$0xff]   ;;  %v3944_v53 = vld [vmem:[%s5801_s3 + $0xc4] ss:$24 sps:$4 sm:$0xff]   ;;  %v3839_v55 = vld [vmem:[%s5799_s1 + $0xf8] ss:$24 sps:$4 sm:$0xff]  }
  0x21   : > { %2760 = vmatprep.subr.bf16.mxu1 %v3932_v44  ;;  %v3844_v56 = vld [vmem:[%s5799_s1 + $0x12c] ss:$24 sps:$4 sm:$0xff]   ;;  %v3952_v58 = vld [vmem:[%s5801_s3 + $0xf0] ss:$24 sps:$4 sm:$0xff]   ;;  %v3847_v60 = vld [vmem:[%s5799_s1 + $0x15c] ss:$24 sps:$4 sm:$0xff]  }
  0x22   : > { %v3950_v57 = vld [vmem:[%s5801_s3 + $0xf4] ss:$24 sps:$4 sm:$0xff]   ;;  %v3842_v59 = vld [vmem:[%s5799_s1 + $0x128] ss:$24 sps:$4 sm:$0xff]   ;;  %v3956_v61 = vld [vmem:[%s5801_s3 + $0x124] ss:$24 sps:$4 sm:$0xff]  }
  0x23   : > { %860 = vmatpush1.bf16.msra.mxu0 %v3790_v11  ;;  %v3958_v62 = vld [vmem:[%s5801_s3 + $0x120] ss:$24 sps:$4 sm:$0xff]   ;;  %v3850_v0 = vld [vmem:[%s5799_s1 + $0x18c] ss:$24 sps:$4 sm:$0xff]   ;;  %v3964_v2 = vld [vmem:[%s5801_s3 + $0x150] ss:$24 sps:$4 sm:$0xff]  }
  0x24   : > { %861 = vmatprep.subr.bf16.mxu0 %v3791_v12  ;;  %2761 = vmatpush1.bf16.msra.mxu1 %v3934_v46  ;;  %v3845_v63 = vld [vmem:[%s5799_s1 + $0x158] ss:$24 sps:$4 sm:$0xff]   ;;  %v3962_v1 = vld [vmem:[%s5801_s3 + $0x154] ss:$24 sps:$4 sm:$0xff]   ;;  %v3848_v3 = vld [vmem:[%s5799_s1 + $0x188] ss:$24 sps:$4 sm:$0xff]  }
  0x25   : > { %2762 = vmatprep.subr.bf16.mxu1 %v3938_v49  ;;  %v3853_v4 = vld [vmem:[%s5799_s1 + $0x1bc] ss:$24 sps:$4 sm:$0xff]   ;;  %v3970_v6 = vld [vmem:[%s5801_s3 + $0x180] ss:$24 sps:$4 sm:$0xff]   ;;  %v3856_v8 = vld [vmem:[%s5799_s1 + $0x1ec] ss:$24 sps:$4 sm:$0xff]  }
  0x26   : > { %v3968_v5 = vld [vmem:[%s5801_s3 + $0x184] ss:$24 sps:$4 sm:$0xff]   ;;  %v3851_v7 = vld [vmem:[%s5799_s1 + $0x1b8] ss:$24 sps:$4 sm:$0xff]   ;;  %v3974_v9 = vld [vmem:[%s5801_s3 + $0x1b4] ss:$24 sps:$4 sm:$0xff]  }
  0x27   : > { %862 = vmatpush1.bf16.msra.mxu0 %v3793_v14  ;;  %v3976_v10 = vld [vmem:[%s5801_s3 + $0x1b0] ss:$24 sps:$4 sm:$0xff]   ;;  %v3859_v12 = vld [vmem:[%s5799_s1 + $0x21c] ss:$24 sps:$4 sm:$0xff]   ;;  %v3887_v42 = vld [vmem:[%s5799_s1 + $0x100] ss:$24 sps:$4 sm:$0xff]  }
  0x28   : > { %863 = vmatprep.subr.bf16.mxu0 %v3794_v15  ;;  %2763 = vmatpush1.bf16.msra.mxu1 %v3940_v50  ;;  %v3854_v11 = vld [vmem:[%s5799_s1 + $0x1e8] ss:$24 sps:$4 sm:$0xff]   ;;  %v3980_v14 = vld [vmem:[%s5801_s3 + $0x1e4] ss:$24 sps:$4 sm:$0xff]   ;;  %s3694_s15 = sshll.u32 %s4471_s22, 8  ;;  %s220_s30 = scalar_lea.vmem [#allocation2], %s3298_s26 }
  0x29   : > { %2764 = vmatprep.subr.bf16.mxu1 %v3944_v53  ;;  %v3982_v15 = vld [vmem:[%s5801_s3 + $0x1e0] ss:$24 sps:$4 sm:$0xff]   ;;  %v3878_v37 = vld [vmem:[%s5799_s1 + $0x70] ss:$24 sps:$4 sm:$0xff]   ;;  %v3883_v38 = vld [vmem:[%s5799_s1 + $0xa4] ss:$24 sps:$4 sm:$0xff]   ;;  %s5751_s8 = scalar_lea.hbm %s5803_s5, %s3694_s15 }
  0x2a   : > { %v3889_v41 = vld [vmem:[%s5799_s1 + $0x104] ss:$24 sps:$4 sm:$0xff]   ;;  %v4006_v46 = vld [vmem:[%s5801_s3 + $0x2a0] ss:$24 sps:$4 sm:$0xff]   ;;  %v4012_v50 = vld [vmem:[%s5801_s3 + $0x2d0] ss:$24 sps:$4 sm:$0xff]  }
  0x2b   : > { %864 = vmatpush1.bf16.msra.mxu0 %v3796_v16  ;;  %v3857_v16 = vld [vmem:[%s5799_s1 + $0x218] ss:$24 sps:$4 sm:$0xff]   ;;  %v4004_v44 = vld [vmem:[%s5801_s3 + $0x2a4] ss:$24 sps:$4 sm:$0xff]   ;;  %s3232_s6 = sshll.u32 %s220_s30, 4  ;;  %vm3215_vm0 = vcmask 523264   ;;  %s5753_s6 = int_to_ptr.vmem [resolvable:$true] %s3232_s6 }
  0x2c   : > { %865 = vmatprep.subr.bf16.mxu0 %v3797_v17  ;;  %2765 = vmatpush1.bf16.msra.mxu1 %v3946_v54  ;;  %v3862_v17 = vld [vmem:[%s5799_s1 + $0x24c] ss:$24 sps:$4 sm:$0xff]   ;;  %v3893_v49 = vld [vmem:[%s5799_s1 + $0x160] ss:$24 sps:$4 sm:$0xff]   ;;  %v3896_v53 = vld [vmem:[%s5799_s1 + $0x190] ss:$24 sps:$4 sm:$0xff]  }
  0x2d   : > { %2766 = vmatprep.subr.bf16.mxu1 %v3950_v57  ;;  %v3901_v54 = vld [vmem:[%s5799_s1 + $0x1c4] ss:$24 sps:$4 sm:$0xff]   ;;  %v3902_v57 = vld [vmem:[%s5799_s1 + $0x1f0] ss:$24 sps:$4 sm:$0xff]   ;;  %s5757_s22 = scalar_lea.sflag [#allocation3], %s218_s25  ;;  %s4352_s9 = scalar_lea.vmem %s5753_s6, 256 }
  0x2e   : > { %p4353_p11 = scmp.ne.s32.totalorder %s5753_s6, %s4352_s9  ;;  %s4417_s10 = smov [#allocation2]  }
  0x2f   : > { %866 = vmatpush1.bf16.msra.mxu0 %v3799_v18  ;;  %v3986_v18 = vld [vmem:[%s5801_s3 + $0x214] ss:$24 sps:$4 sm:$0xff]   ;;  %s4356_s11 = sshll.u32 %s4417_s10, 4  ;;  %s4357_s11 = int_to_ptr.vmem [resolvable:$false] %s4356_s11 }
  0x30   : > { %867 = vmatprep.subr.bf16.mxu0 %v3800_v19  ;;  %2767 = vmatpush1.bf16.msra.mxu1 %v3952_v58  ;;  %v3988_v19 = vld [vmem:[%s5801_s3 + $0x210] ss:$24 sps:$4 sm:$0xff]   ;;  %v3907_v58 = vld [vmem:[%s5799_s1 + $0x224] ss:$24 sps:$4 sm:$0xff]   ;;  %p4354_p12 = pnand %p4353_p11, %p4488_p5  ;;  %s4358_s12 = scalar_lea.vmem %s4357_s11, 512 }
  0x31   : > { %2768 = vmatprep.subr.bf16.mxu1 %v3956_v61  ;;  %v3908_v61 = vld [vmem:[%s5799_s1 + $0x250] ss:$24 sps:$4 sm:$0xff]   ;;  %p4359_p0 = scmp.lt.s32.totalorder %s5753_s6, %s4357_s11  ;;  %p4360_p1 = scmp.lt.s32.totalorder %s4358_s12, %s4352_s9 }
  0x32   : > { %p4355_p13 = pneg %p4354_p12 }
  0x33   : > { %868 = vmatpush1.bf16.msra.mxu0 %v3802_v20  ;;  %v3860_v20 = vld [vmem:[%s5799_s1 + $0x248] ss:$24 sps:$4 sm:$0xff]   ;;  %p4361_p2 = por %p4360_p1, %p4359_p0 }
  0x34   : > { %869 = vmatprep.subr.bf16.mxu0 %v3803_v21  ;;  %2769 = vmatpush1.bf16.msra.mxu1 %v3958_v62  ;;  %v3865_v21 = vld [vmem:[%s5799_s1 + $0x27c] ss:$24 sps:$4 sm:$0xff]  }
  0x35   : > { %2770 = vmatprep.subr.bf16.mxu1 %v3962_v1  ;;  %v3913_v62 = vld [vmem:[%s5799_s1 + $0x284] ss:$24 sps:$4 sm:$0xff]   ;;  %v3914_v1 = vld [vmem:[%s5799_s1 + $0x2b0] ss:$24 sps:$4 sm:$0xff]   ;;  %p4362_p3 = pnand %p4361_p2, %p4355_p13 }
  0x37   : > { %870 = vmatpush1.bf16.msra.mxu0 %v3805_v22  ;;  %v3992_v22 = vld [vmem:[%s5801_s3 + $0x244] ss:$24 sps:$4 sm:$0xff]  }
  0x38   : > { %871 = vmatprep.subr.bf16.mxu0 %v3806_v23  ;;  %2771 = vmatpush1.bf16.msra.mxu1 %v3964_v2  ;;  %v3994_v23 = vld [vmem:[%s5801_s3 + $0x240] ss:$24 sps:$4 sm:$0xff]   ;;  %v3919_v2 = vld [vmem:[%s5799_s1 + $0x2e4] ss:$24 sps:$4 sm:$0xff]  }
  0x39   : > { %2772 = vmatprep.subr.bf16.mxu1 %v3968_v5  ;;  %v3923_v5 = vld [vmem:[%s5801_s3 + $0x8] ss:$24 sps:$4 sm:$0xff]  }
  0x3b   : > { %872 = vmatpush1.bf16.msra.mxu0 %v3808_v24  ;;  %v3863_v24 = vld [vmem:[%s5799_s1 + $0x278] ss:$24 sps:$4 sm:$0xff]  }
  0x3c   : > { %873 = vmatprep.subr.bf16.mxu0 %v3809_v25  ;;  %2773 = vmatpush1.bf16.msra.mxu1 %v3970_v6  ;;  %v3998_v25 = vld [vmem:[%s5801_s3 + $0x274] ss:$24 sps:$4 sm:$0xff]  }
  0x3d   : > { %2774 = vmatprep.subr.bf16.mxu1 %v3974_v9  ;;  %v3931_v6 = vld [vmem:[%s5801_s3 + $0x3c] ss:$24 sps:$4 sm:$0xff]   ;;  %v3935_v9 = vld [vmem:[%s5801_s3 + $0x68] ss:$24 sps:$4 sm:$0xff]  }
  0x3f   : > { %874 = vmatpush1.bf16.msra.mxu0 %v3811_v26  ;;  %v3868_v26 = vld [vmem:[%s5799_s1 + $0x2ac] ss:$24 sps:$4 sm:$0xff]  }
  0x40   : > { %875 = vmatprep.subr.bf16.mxu0 %v3812_v27  ;;  %2775 = vmatpush1.bf16.msra.mxu1 %v3976_v10  ;;  %v4000_v27 = vld [vmem:[%s5801_s3 + $0x270] ss:$24 sps:$4 sm:$0xff]  }
  0x41   : > { %2776 = vmatprep.subr.bf16.mxu1 %v3980_v14  ;;  %v3941_v10 = vld [vmem:[%s5801_s3 + $0x98] ss:$24 sps:$4 sm:$0xff]   ;;  %v3955_v14 = vld [vmem:[%s5801_s3 + $0xfc] ss:$24 sps:$4 sm:$0xff]  }
  0x43   : > { %876 = vmatpush1.bf16.msra.mxu0 %v3814_v28  ;;  %v3866_v28 = vld [vmem:[%s5799_s1 + $0x2a8] ss:$24 sps:$4 sm:$0xff]  }
  0x44   : > { %877 = vmatprep.subr.bf16.mxu0 %v3815_v29  ;;  %2777 = vmatpush1.bf16.msra.mxu1 %v3982_v15  ;;  %v3871_v29 = vld [vmem:[%s5799_s1 + $0x2dc] ss:$24 sps:$4 sm:$0xff]   ;;  %v3953_v15 = vld [vmem:[%s5801_s3 + $0xf8] ss:$24 sps:$4 sm:$0xff]  }
  0x45   : > { %2778 = vmatprep.subr.bf16.mxu1 %v3986_v18  ;;  %v3967_v18 = vld [vmem:[%s5801_s3 + $0x15c] ss:$24 sps:$4 sm:$0xff]  }
  0x47   : > { %878 = vmatpush1.bf16.msra.mxu0 %v3817_v30  ;;  %v3869_v30 = vld [vmem:[%s5799_s1 + $0x2d8] ss:$24 sps:$4 sm:$0xff]  }
  0x48   : > { %879 = vmatprep.subr.bf16.mxu0 %v3818_v31  ;;  %2779 = vmatpush1.bf16.msra.mxu1 %v3988_v19  ;;  %v3874_v31 = vld [vmem:[%s5799_s1 + $0x14] ss:$24 sps:$4 sm:$0xff]   ;;  %v3965_v19 = vld [vmem:[%s5801_s3 + $0x158] ss:$24 sps:$4 sm:$0xff]  }
  0x49   : > { %2780 = vmatprep.subr.bf16.mxu1 %v3992_v22  ;;  %v3979_v22 = vld [vmem:[%s5801_s3 + $0x1bc] ss:$24 sps:$4 sm:$0xff]  }
  0x4b   : > { %880 = vmatpush1.bf16.msra.mxu0 %v3820_v32  ;;  %v3872_v32 = vld [vmem:[%s5799_s1 + $0x10] ss:$24 sps:$4 sm:$0xff]  }
  0x4c   : > { %892 = vmatprep.subr.bf16.mxu0 %v3826_v33  ;;  %2781 = vmatpush1.bf16.msra.mxu1 %v3994_v23  ;;  %v3877_v33 = vld [vmem:[%s5799_s1 + $0x44] ss:$24 sps:$4 sm:$0xff]   ;;  %v3977_v23 = vld [vmem:[%s5801_s3 + $0x1b8] ss:$24 sps:$4 sm:$0xff]  }
  0x4d   : > { %2782 = vmatprep.subr.bf16.mxu1 %v3998_v25  ;;  %v3983_v25 = vld [vmem:[%s5801_s3 + $0x1e8] ss:$24 sps:$4 sm:$0xff]  }
  0x4e   : > { %882 = vmatmul.mubr.bf16.vlgmr.msra.gmra.mrb[0].mxu0 %v4608_v34 }
  0x4f   : > { %893 = vmatpush1.bf16.msra.mxu0 %v3824_v35  ;;  %924 = vmatprep.mubr.bf16.mxu0 %v4544_v13  ;;  %v3875_v35 = vld [vmem:[%s5799_s1 + $0x40] ss:$24 sps:$4 sm:$0xff]  }
  0x50   : > { %894 = vmatprep.subr.bf16.mxu0 %v3829_v36  ;;  %2783 = vmatpush1.bf16.msra.mxu1 %v4000_v27  ;;  %v3880_v36 = vld [vmem:[%s5799_s1 + $0x74] ss:$24 sps:$4 sm:$0xff]   ;;  %v3989_v27 = vld [vmem:[%s5801_s3 + $0x218] ss:$24 sps:$4 sm:$0xff]  }
  0x51   : > { %2784 = vmatprep.subr.bf16.mxu1 %v4004_v44 }
  0x53   : > { %895 = vmatpush1.bf16.msra.mxu0 %v3827_v39  ;;  %v3881_v39 = vld [vmem:[%s5799_s1 + $0xa0] ss:$24 sps:$4 sm:$0xff]  }
  0x54   : > { %896 = vmatprep.subr.bf16.mxu0 %v3832_v40  ;;  %v3886_v40 = vld [vmem:[%s5799_s1 + $0xd4] ss:$24 sps:$4 sm:$0xff]   ;;  %2785 = vmatpush1.bf16.msra.mxu1 %v4006_v46 }
  0x57   : > { %897 = vmatpush1.bf16.msra.mxu0 %v3830_v43  ;;  %v3892_v43 = vld [vmem:[%s5799_s1 + $0x134] ss:$24 sps:$4 sm:$0xff]  }
  0x58   : > { %898 = vmatprep.subr.bf16.mxu0 %v3835_v45  ;;  %v3890_v45 = vld [vmem:[%s5799_s1 + $0x130] ss:$24 sps:$4 sm:$0xff]  }
  0x5b   : > { %899 = vmatpush1.bf16.msra.mxu0 %v3833_v47  ;;  %v3895_v47 = vld [vmem:[%s5799_s1 + $0x164] ss:$24 sps:$4 sm:$0xff]  }
  0x5c   : > { %900 = vmatprep.subr.bf16.mxu0 %v3838_v48  ;;  %v4010_v48 = vld [vmem:[%s5801_s3 + $0x2d4] ss:$24 sps:$4 sm:$0xff]  }
  0x5d   : > { %2786 = vmatprep.subr.bf16.mxu1 %v4010_v48 }
  0x5e   : > { %2787 = vmatpush1.bf16.msra.mxu1 %v4012_v50 }
  0x5f   : > { %901 = vmatpush1.bf16.msra.mxu0 %v3836_v51  ;;  %v3898_v51 = vld [vmem:[%s5799_s1 + $0x194] ss:$24 sps:$4 sm:$0xff]  }
  0x60   : > { %902 = vmatprep.subr.bf16.mxu0 %v3841_v52  ;;  %v4018_v52 = vld [vmem:[%s5801_s3 + $0x304] ss:$24 sps:$4 sm:$0xff]  }
  0x61   : > { %2799 = vmatprep.subr.bf16.mxu1 %v4018_v52 }
  0x63   : > { %903 = vmatpush1.bf16.msra.mxu0 %v3839_v55  ;;  %v3899_v55 = vld [vmem:[%s5799_s1 + $0x1c0] ss:$24 sps:$4 sm:$0xff]  }
  0x64   : > { %904 = vmatprep.subr.bf16.mxu0 %v3844_v56  ;;  %v3904_v56 = vld [vmem:[%s5799_s1 + $0x1f4] ss:$24 sps:$4 sm:$0xff]  }
  0x67   : > { %905 = vmatpush1.bf16.msra.mxu0 %v3842_v59  ;;  %v3905_v59 = vld [vmem:[%s5799_s1 + $0x220] ss:$24 sps:$4 sm:$0xff]  }
  0x68   : > { %906 = vmatprep.subr.bf16.mxu0 %v3847_v60  ;;  %v3910_v60 = vld [vmem:[%s5799_s1 + $0x254] ss:$24 sps:$4 sm:$0xff]  }
  0x6b   : > { %907 = vmatpush1.bf16.msra.mxu0 %v3845_v63  ;;  %v3911_v63 = vld [vmem:[%s5799_s1 + $0x280] ss:$24 sps:$4 sm:$0xff]  }
  0x6c   : > { %908 = vmatprep.subr.bf16.mxu0 %v3850_v0  ;;  %v3916_v0 = vld [vmem:[%s5799_s1 + $0x2b4] ss:$24 sps:$4 sm:$0xff]  }
  0x6f   : > { %909 = vmatpush1.bf16.msra.mxu0 %v3848_v3  ;;  %v3917_v3 = vld [vmem:[%s5799_s1 + $0x2e0] ss:$24 sps:$4 sm:$0xff]  }
  0x70   : > { %910 = vmatprep.subr.bf16.mxu0 %v3853_v4  ;;  %v3925_v4 = vld [vmem:[%s5801_s3 + $0xc] ss:$24 sps:$4 sm:$0xff]  }
  0x73   : > { %911 = vmatpush1.bf16.msra.mxu0 %v3851_v7  ;;  %v3929_v7 = vld [vmem:[%s5801_s3 + $0x38] ss:$24 sps:$4 sm:$0xff]  }
  0x74   : > { %912 = vmatprep.subr.bf16.mxu0 %v3856_v8  ;;  %v3937_v8 = vld [vmem:[%s5801_s3 + $0x6c] ss:$24 sps:$4 sm:$0xff]  }
  0x77   : > { %913 = vmatpush1.bf16.msra.mxu0 %v3854_v11  ;;  %v3949_v11 = vld [vmem:[%s5801_s3 + $0xcc] ss:$24 sps:$4 sm:$0xff]  }
  0x78   : > { %914 = vmatprep.subr.bf16.mxu0 %v3859_v12  ;;  %v3947_v12 = vld [vmem:[%s5801_s3 + $0xc8] ss:$24 sps:$4 sm:$0xff]  }
  0x7b   : > { %915 = vmatpush1.bf16.msra.mxu0 %v3857_v16  ;;  %v3961_v16 = vld [vmem:[%s5801_s3 + $0x12c] ss:$24 sps:$4 sm:$0xff]  }
  0x7c   : > { %916 = vmatprep.subr.bf16.mxu0 %v3862_v17  ;;  %v3959_v17 = vld [vmem:[%s5801_s3 + $0x128] ss:$24 sps:$4 sm:$0xff]  }
  0x7f   : > { %917 = vmatpush1.bf16.msra.mxu0 %v3860_v20  ;;  %v3973_v20 = vld [vmem:[%s5801_s3 + $0x18c] ss:$24 sps:$4 sm:$0xff]  }
  0x80   : > { %918 = vmatprep.subr.bf16.mxu0 %v3865_v21  ;;  %v3971_v21 = vld [vmem:[%s5801_s3 + $0x188] ss:$24 sps:$4 sm:$0xff]  }
  0x83   : > { %919 = vmatpush1.bf16.msra.mxu0 %v3863_v24  ;;  %v3985_v24 = vld [vmem:[%s5801_s3 + $0x1ec] ss:$24 sps:$4 sm:$0xff]  }
  0x84   : > { %920 = vmatprep.subr.bf16.mxu0 %v3868_v26  ;;  %v3991_v26 = vld [vmem:[%s5801_s3 + $0x21c] ss:$24 sps:$4 sm:$0xff]  }
  0x87   : > { %921 = vmatpush1.bf16.msra.mxu0 %v3866_v28  ;;  %v3997_v28 = vld [vmem:[%s5801_s3 + $0x24c] ss:$24 sps:$4 sm:$0xff]  }
  0x88   : > { %922 = vmatprep.subr.bf16.mxu0 %v3871_v29  ;;  %v3995_v29 = vld [vmem:[%s5801_s3 + $0x248] ss:$24 sps:$4 sm:$0xff]  }
  0x8b   : > { %923 = vmatpush1.bf16.msra.mxu0 %v3869_v30  ;;  %v4003_v30 = vld [vmem:[%s5801_s3 + $0x27c] ss:$24 sps:$4 sm:$0xff]  }
  0x8c   : > { %935 = vmatprep.subr.bf16.mxu0 %v3874_v31  ;;  %v4001_v31 = vld [vmem:[%s5801_s3 + $0x278] ss:$24 sps:$4 sm:$0xff]  }
  0x8e   : > { %925 = vmatmul.mubr.bf16.vlgmr.msra.gmra.mrb[4].mxu0 %v4608_v34 }
  0x8f   : > { %936 = vmatpush1.bf16.msra.mxu0 %v3872_v32  ;;  %967 = vmatprep.mubr.bf16.mxu0 %v4544_v13  ;;  %v3884_v13 = vld [vmem:[%s5799_s1 + $0xd0] ss:$24 sps:$4 sm:$0xff]   ;;  %v4009_v32 = vld [vmem:[%s5801_s3 + $0x2ac] ss:$24 sps:$4 sm:$0xff]  }
  0x90   : > { %937 = vmatprep.subr.bf16.mxu0 %v3877_v33  ;;  %v4007_v33 = vld [vmem:[%s5801_s3 + $0x2a8] ss:$24 sps:$4 sm:$0xff]  }
  0x93   : > { %938 = vmatpush1.bf16.msra.mxu0 %v3875_v35  ;;  %v4015_v35 = vld [vmem:[%s5801_s3 + $0x2dc] ss:$24 sps:$4 sm:$0xff]  }
  0x94   : > { %939 = vmatprep.subr.bf16.mxu0 %v3880_v36  ;;  %v4013_v36 = vld [vmem:[%s5801_s3 + $0x2d8] ss:$24 sps:$4 sm:$0xff]  }
  0x97   : > { %940 = vmatpush1.bf16.msra.mxu0 %v3878_v37  ;;  %v4021_v37 = vld [vmem:[%s5801_s3 + $0x30c] ss:$24 sps:$4 sm:$0xff]  }
  0x98   : > { %941 = vmatprep.subr.bf16.mxu0 %v3883_v38  ;;  %v329_v38 = vlaneseq }
  0x9b   : > { %942 = vmatpush1.bf16.msra.mxu0 %v3881_v39  ;;  %v5002_v39 = vshrl.u32 %v329_v38, 7  ;;  %v4087_v38 = vld [vmem:[%s5801_s3 + $0x51c] ss:$24 sps:$4 sm:$0xff]  }
  0x9c   : > { %943 = vmatprep.subr.bf16.mxu0 %v3886_v40 }
  0x9d   : > { %v331_v40 = vsub.s32 0, %v5002_v39 }
  0x9f   : > { %944 = vmatpush1.bf16.msra.mxu0 %v3884_v13  ;;  %v5008_v13 = vld [vmem:[%s5800_s2] sm:$0x3f] }
  0xa0   : > { %945 = vmatprep.subr.bf16.mxu0 %v3889_v41  ;;  %v335_v41 = vsub.s32 1, %v5002_v39 }
  0xa3   : > { %946 = vmatpush1.bf16.msra.mxu0 %v3887_v42  ;;  %v332_v42 = vrot.slane %v5008_v13, %v331_v40 }
  0xa4   : > { %947 = vmatprep.subr.bf16.mxu0 %v3892_v43  ;;  %v336_v43 = vrot.slane %v5008_v13, %v335_v41 }
  0xa7   : > { %948 = vmatpush1.bf16.msra.mxu0 %v3890_v45 }
  0xa8   : > { %949 = vmatprep.subr.bf16.mxu0 %v3895_v47 }
  0xab   : > { %950 = vmatpush1.bf16.msra.mxu0 %v3893_v49 }
  0xac   : > { %951 = vmatprep.subr.bf16.mxu0 %v3898_v51 }
  0xaf   : > { %952 = vmatpush1.bf16.msra.mxu0 %v3896_v53 }
  0xb0   : > { %953 = vmatprep.subr.bf16.mxu0 %v3901_v54 }
  0xb3   : > { %954 = vmatpush1.bf16.msra.mxu0 %v3899_v55 }
  0xb4   : > { %955 = vmatprep.subr.bf16.mxu0 %v3904_v56 }
  0xb7   : > { %956 = vmatpush1.bf16.msra.mxu0 %v3902_v57 }
  0xb8   : > { %957 = vmatprep.subr.bf16.mxu0 %v3907_v58  ;;  %v4016_v58 = vld [vmem:[%s5801_s3 + $0x300] ss:$24 sps:$4 sm:$0xff]  }
  0xbb   : > { %958 = vmatpush1.bf16.msra.mxu0 %v3905_v59  ;;  %v4019_v59 = vld [vmem:[%s5801_s3 + $0x308] ss:$24 sps:$4 sm:$0xff]  }
  0xbc   : > { %959 = vmatprep.subr.bf16.mxu0 %v3910_v60  ;;  %v4024_v60 = vld [vmem:[%s5801_s3 + $0x334] ss:$24 sps:$4 sm:$0xff]  }
  0xbf   : > { %960 = vmatpush1.bf16.msra.mxu0 %v3908_v61  ;;  %v4027_v61 = vld [vmem:[%s5801_s3 + $0x33c] ss:$24 sps:$4 sm:$0xff]  }
  0xc0   : > { %961 = vmatprep.subr.bf16.mxu0 %v3913_v62  ;;  %v4022_v62 = vld [vmem:[%s5801_s3 + $0x330] ss:$24 sps:$4 sm:$0xff]  }
  0xc3   : > { %962 = vmatpush1.bf16.msra.mxu0 %v3911_v63  ;;  %v4025_v63 = vld [vmem:[%s5801_s3 + $0x338] ss:$24 sps:$4 sm:$0xff]  }
  0xc4   : > { %963 = vmatprep.subr.bf16.mxu0 %v3916_v0  ;;  %v4030_v0 = vld [vmem:[%s5801_s3 + $0x364] ss:$24 sps:$4 sm:$0xff]  }
  0xc7   : > { %964 = vmatpush1.bf16.msra.mxu0 %v3914_v1  ;;  %v4033_v1 = vld [vmem:[%s5801_s3 + $0x36c] ss:$24 sps:$4 sm:$0xff]  }
  0xc8   : > { %965 = vmatprep.subr.bf16.mxu0 %v3919_v2  ;;  %v4028_v2 = vld [vmem:[%s5801_s3 + $0x360] ss:$24 sps:$4 sm:$0xff]  }
  0xcb   : > { %966 = vmatpush1.bf16.msra.mxu0 %v3917_v3  ;;  %v4031_v3 = vld [vmem:[%s5801_s3 + $0x368] ss:$24 sps:$4 sm:$0xff]  }
  0xcc   : > { %2885 = vmatprep.subr.bf16.mxu0 %v3925_v4  ;;  %v4036_v4 = vld [vmem:[%s5801_s3 + $0x394] ss:$24 sps:$4 sm:$0xff]  }
  0xce   : > { %968 = vmatmul.mubr.bf16.vlgmr.msra.gmra.mrb[8].mxu0 %v4608_v34  ;;  %v3943_v34 = vld [vmem:[%s5801_s3 + $0x9c] ss:$24 sps:$4 sm:$0xff]  }
  0xcf   : > { %2886 = vmatpush1.bf16.msra.mxu0 %v3923_v5  ;;  %v4039_v5 = vld [vmem:[%s5801_s3 + $0x39c] ss:$24 sps:$4 sm:$0xff]  }
  0xd0   : > { %2887 = vmatprep.subr.bf16.mxu0 %v3931_v6  ;;  %v4034_v6 = vld [vmem:[%s5801_s3 + $0x390] ss:$24 sps:$4 sm:$0xff]  }
  0xd3   : > { %2888 = vmatpush1.bf16.msra.mxu0 %v3929_v7  ;;  %v4037_v7 = vld [vmem:[%s5801_s3 + $0x398] ss:$24 sps:$4 sm:$0xff]  }
  0xd4   : > { %2889 = vmatprep.subr.bf16.mxu0 %v3937_v8  ;;  %v4042_v8 = vld [vmem:[%s5801_s3 + $0x3c4] ss:$24 sps:$4 sm:$0xff]  }
  0xd7   : > { %2890 = vmatpush1.bf16.msra.mxu0 %v3935_v9  ;;  %v4045_v9 = vld [vmem:[%s5801_s3 + $0x3cc] ss:$24 sps:$4 sm:$0xff]  }
  0xd8   : > { %2891 = vmatprep.subr.bf16.mxu0 %v3943_v34  ;;  %v4040_v34 = vld [vmem:[%s5801_s3 + $0x3c0] ss:$24 sps:$4 sm:$0xff]  }
  0xdb   : > { %2892 = vmatpush1.bf16.msra.mxu0 %v3941_v10  ;;  %v4043_v10 = vld [vmem:[%s5801_s3 + $0x3c8] ss:$24 sps:$4 sm:$0xff]  }
  0xdc   : > { %2893 = vmatprep.subr.bf16.mxu0 %v3949_v11  ;;  %v4048_v11 = vld [vmem:[%s5801_s3 + $0x3f4] ss:$24 sps:$4 sm:$0xff]  }
  0xdf   : > { %2894 = vmatpush1.bf16.msra.mxu0 %v3947_v12  ;;  %v4051_v12 = vld [vmem:[%s5801_s3 + $0x3fc] ss:$24 sps:$4 sm:$0xff]  }
  0xe0   : > { %2895 = vmatprep.subr.bf16.mxu0 %v3955_v14  ;;  %v4046_v14 = vld [vmem:[%s5801_s3 + $0x3f0] ss:$24 sps:$4 sm:$0xff]  }
  0xe3   : > { %2896 = vmatpush1.bf16.msra.mxu0 %v3953_v15  ;;  %v4049_v15 = vld [vmem:[%s5801_s3 + $0x3f8] ss:$24 sps:$4 sm:$0xff]  }
  0xe4   : > { %2897 = vmatprep.subr.bf16.mxu0 %v3961_v16  ;;  %v4054_v16 = vld [vmem:[%s5801_s3 + $0x424] ss:$24 sps:$4 sm:$0xff]  }
  0xe7   : > { %2898 = vmatpush1.bf16.msra.mxu0 %v3959_v17  ;;  %v4057_v17 = vld [vmem:[%s5801_s3 + $0x42c] ss:$24 sps:$4 sm:$0xff]  }
  0xe8   : > { %2899 = vmatprep.subr.bf16.mxu0 %v3967_v18  ;;  %v4052_v18 = vld [vmem:[%s5801_s3 + $0x420] ss:$24 sps:$4 sm:$0xff]  }
  0xeb   : > { %2900 = vmatpush1.bf16.msra.mxu0 %v3965_v19  ;;  %v4055_v19 = vld [vmem:[%s5801_s3 + $0x428] ss:$24 sps:$4 sm:$0xff]  }
  0xec   : > { %2901 = vmatprep.subr.bf16.mxu0 %v3973_v20  ;;  %v4060_v20 = vld [vmem:[%s5801_s3 + $0x454] ss:$24 sps:$4 sm:$0xff]  }
  0xef   : > { %2902 = vmatpush1.bf16.msra.mxu0 %v3971_v21  ;;  %v4063_v21 = vld [vmem:[%s5801_s3 + $0x45c] ss:$24 sps:$4 sm:$0xff]  }
  0xf0   : > { %2903 = vmatprep.subr.bf16.mxu0 %v3979_v22  ;;  %v4058_v22 = vld [vmem:[%s5801_s3 + $0x450] ss:$24 sps:$4 sm:$0xff]  }
  0xf3   : > { %2904 = vmatpush1.bf16.msra.mxu0 %v3977_v23  ;;  %v4061_v23 = vld [vmem:[%s5801_s3 + $0x458] ss:$24 sps:$4 sm:$0xff]  }
  0xf4   : > { %2905 = vmatprep.subr.bf16.mxu0 %v3985_v24  ;;  %v4066_v24 = vld [vmem:[%s5801_s3 + $0x484] ss:$24 sps:$4 sm:$0xff]  }
  0xf7   : > { %2906 = vmatpush1.bf16.msra.mxu0 %v3983_v25  ;;  %v4069_v25 = vld [vmem:[%s5801_s3 + $0x48c] ss:$24 sps:$4 sm:$0xff]  }
  0xf8   : > { %2907 = vmatprep.subr.bf16.mxu0 %v3991_v26  ;;  %v4064_v26 = vld [vmem:[%s5801_s3 + $0x480] ss:$24 sps:$4 sm:$0xff]  }
  0xfb   : > { %2908 = vmatpush1.bf16.msra.mxu0 %v3989_v27  ;;  %v4067_v27 = vld [vmem:[%s5801_s3 + $0x488] ss:$24 sps:$4 sm:$0xff]  }
  0xfc   : > { %2909 = vmatprep.subr.bf16.mxu0 %v3997_v28  ;;  %v4072_v28 = vld [vmem:[%s5801_s3 + $0x4b4] ss:$24 sps:$4 sm:$0xff]  }
  0xff   : > { %2910 = vmatpush1.bf16.msra.mxu0 %v3995_v29  ;;  %v4075_v29 = vld [vmem:[%s5801_s3 + $0x4bc] ss:$24 sps:$4 sm:$0xff]  }
 0x100   : > { %2911 = vmatprep.subr.bf16.mxu0 %v4003_v30  ;;  %v4070_v30 = vld [vmem:[%s5801_s3 + $0x4b0] ss:$24 sps:$4 sm:$0xff]  }
 0x103   : > { %2912 = vmatpush1.bf16.msra.mxu0 %v4001_v31  ;;  %v4073_v31 = vld [vmem:[%s5801_s3 + $0x4b8] ss:$24 sps:$4 sm:$0xff]  }
 0x104   : > { %2913 = vmatprep.subr.bf16.mxu0 %v4009_v32  ;;  %v4078_v32 = vld [vmem:[%s5801_s3 + $0x4e4] ss:$24 sps:$4 sm:$0xff]  }
 0x107   : > { %2914 = vmatpush1.bf16.msra.mxu0 %v4007_v33  ;;  %v4081_v33 = vld [vmem:[%s5801_s3 + $0x4ec] ss:$24 sps:$4 sm:$0xff]  }
 0x108   : > { %2915 = vmatprep.subr.bf16.mxu0 %v4015_v35  ;;  %v4076_v35 = vld [vmem:[%s5801_s3 + $0x4e0] ss:$24 sps:$4 sm:$0xff]  }
 0x10b   : > { %2916 = vmatpush1.bf16.msra.mxu0 %v4013_v36  ;;  %v4079_v36 = vld [vmem:[%s5801_s3 + $0x4e8] ss:$24 sps:$4 sm:$0xff]  }
 0x10c   : > { %2928 = vmatprep.subr.bf16.mxu0 %v4021_v37  ;;  %v4084_v37 = vld [vmem:[%s5801_s3 + $0x514] ss:$24 sps:$4 sm:$0xff]  }
 0x121   : > { %v883_v44 = vpop.f32.mrb[0].mxu0 }
 0x122   : > { %v884_v45 = vadd.f32 %v883_v44, %v332_v42  ;;  %v885_v46 = vpop.f32.mrb[1].mxu0  ;;  %v4090_v44 = vld [vmem:[%s5801_s3 + $0x544] ss:$24 sps:$4 sm:$0xff]  }
 0x123   : > { %v886_v47 = vadd.f32 %v885_v46, %v336_v43  ;;  %v887_v48 = vpop.f32.mrb[2].mxu0  ;;  %v4088_v46 = vld [vmem:[%s5801_s3 + $0x540] ss:$24 sps:$4 sm:$0xff]  }
 0x124   : > { %v888_v49 = vadd.f32 %v887_v48, %v332_v42  ;;  %v889_v50 = vpop.f32.mrb[3].mxu0  ;;  %v978_v52 = vmax.f32 %v884_v45, 0.0  ;;  %v4082_v42 = vld [vmem:[%s5801_s3 + $0x510] ss:$24 sps:$4 sm:$0xff]   ;;  %v4093_v45 = vld [vmem:[%s5801_s3 + $0x54c] ss:$24 sps:$4 sm:$0xff]  }
 0x125   : > { %v890_v51 = vadd.f32 %v889_v50, %v336_v43  ;;  %v979_v54 = vmax.f32 %v886_v47, 0.0  ;;  %v4085_v43 = vld [vmem:[%s5801_s3 + $0x518] ss:$24 sps:$4 sm:$0xff]   ;;  %v4091_v47 = vld [vmem:[%s5801_s3 + $0x548] ss:$24 sps:$4 sm:$0xff]   ;;  %v339_v50 = vsub.s32 2, %v5002_v39 }
 0x126   : > { %v984_v53 = vmax.f32 %v888_v49, 0.0  ;;  %v4096_v48 = vld [vmem:[%s5801_s3 + $0x574] ss:$24 sps:$4 sm:$0xff]  }
 0x127   : > { %v985_v55 = vmax.f32 %v890_v51, 0.0  ;;  %v4099_v49 = vld [vmem:[%s5801_s3 + $0x57c] ss:$24 sps:$4 sm:$0xff]   ;;  %v343_v51 = vsub.s32 3, %v5002_v39 }
 0x128   : > { %v5017_v56 = vpack.c.bf16 %v984_v53, %v978_v52  ;;  %v4094_v52 = vld [vmem:[%s5801_s3 + $0x570] ss:$24 sps:$4 sm:$0xff]  }
 0x129   : > { %v5019_v57 = vpack.c.bf16 %v985_v55, %v979_v54  ;;  %v4097_v53 = vld [vmem:[%s5801_s3 + $0x578] ss:$24 sps:$4 sm:$0xff]   ;;  %v340_v54 = vrot.slane %v5008_v13, %v339_v50  ;;  %v4102_v55 = vld [vmem:[%s5801_s3 + $0x5a4] ss:$24 sps:$4 sm:$0xff]  }
 0x12b   : > { %2788 = vmatprep.mubr.bf16.mxu1 %v5019_v57  ;;  %2917 = vmatprep.mubr.bf16.mxu0 %v5019_v57 }
 0x12c   : > { %2789 = vmatmul.mubr.bf16.vlgmr.msra.gmra.mrb[0].mxu1 %v5017_v56  ;;  %2918 = vmatmul.mubr.bf16.vlgmr.msra.gmra.mrb[12].mxu0 %v5017_v56 }
 0x12d   : > { %2800 = vmatpush1.bf16.msra.mxu1 %v4016_v58  ;;  %2929 = vmatpush1.bf16.msra.mxu0 %v4019_v59  ;;  %v4105_v58 = vld [vmem:[%s5801_s3 + $0x5ac] ss:$24 sps:$4 sm:$0xff]   ;;  %v344_v59 = vrot.slane %v5008_v13, %v343_v51 }
 0x12e   : > { %2801 = vmatprep.subr.bf16.mxu1 %v4024_v60  ;;  %2930 = vmatprep.subr.bf16.mxu0 %v4027_v61  ;;  %v4100_v61 = vld [vmem:[%s5801_s3 + $0x5a0] ss:$24 sps:$4 sm:$0xff]  }
 0x131   : > { %2802 = vmatpush1.bf16.msra.mxu1 %v4022_v62  ;;  %2931 = vmatpush1.bf16.msra.mxu0 %v4025_v63  ;;  %v4103_v62 = vld [vmem:[%s5801_s3 + $0x5a8] ss:$24 sps:$4 sm:$0xff]  }
 0x132   : > { %2803 = vmatprep.subr.bf16.mxu1 %v4030_v0  ;;  %2932 = vmatprep.subr.bf16.mxu0 %v4033_v1  ;;  %v4108_v1 = vld [vmem:[%s5801_s3 + $0x5d4] ss:$24 sps:$4 sm:$0xff]  }
 0x135   : > { %2804 = vmatpush1.bf16.msra.mxu1 %v4028_v2  ;;  %2933 = vmatpush1.bf16.msra.mxu0 %v4031_v3  ;;  %v4111_v2 = vld [vmem:[%s5801_s3 + $0x5dc] ss:$24 sps:$4 sm:$0xff]  }
 0x136   : > { %2805 = vmatprep.subr.bf16.mxu1 %v4036_v4  ;;  %2934 = vmatprep.subr.bf16.mxu0 %v4039_v5 }
 0x139   : > { %2806 = vmatpush1.bf16.msra.mxu1 %v4034_v6  ;;  %2935 = vmatpush1.bf16.msra.mxu0 %v4037_v7 }
 0x13a   : > { %2807 = vmatprep.subr.bf16.mxu1 %v4042_v8  ;;  %2936 = vmatprep.subr.bf16.mxu0 %v4045_v9  ;;  %v4106_v8 = vld [vmem:[%s5801_s3 + $0x5d0] ss:$24 sps:$4 sm:$0xff]  }
 0x13b   : > { %v4109_v9 = vld [vmem:[%s5801_s3 + $0x5d8] ss:$24 sps:$4 sm:$0xff]  }
 0x13d   : > { %2808 = vmatpush1.bf16.msra.mxu1 %v4040_v34  ;;  %2937 = vmatpush1.bf16.msra.mxu0 %v4043_v10 }
 0x13e   : > { %2809 = vmatprep.subr.bf16.mxu1 %v4048_v11  ;;  %2938 = vmatprep.subr.bf16.mxu0 %v4051_v12  ;;  %v4114_v11 = vld [vmem:[%s5801_s3 + $0x604] ss:$24 sps:$4 sm:$0xff]  }
 0x13f   : > { %v4117_v12 = vld [vmem:[%s5801_s3 + $0x60c] ss:$24 sps:$4 sm:$0xff]  }
 0x141   : > { %2810 = vmatpush1.bf16.msra.mxu1 %v4046_v14  ;;  %2939 = vmatpush1.bf16.msra.mxu0 %v4049_v15 }
 0x142   : > { %2811 = vmatprep.subr.bf16.mxu1 %v4054_v16  ;;  %2940 = vmatprep.subr.bf16.mxu0 %v4057_v17 }
 0x145   : > { %2812 = vmatpush1.bf16.msra.mxu1 %v4052_v18  ;;  %2941 = vmatpush1.bf16.msra.mxu0 %v4055_v19  ;;  %v4112_v18 = vld [vmem:[%s5801_s3 + $0x600] ss:$24 sps:$4 sm:$0xff]  }
 0x146   : > { %2813 = vmatprep.subr.bf16.mxu1 %v4060_v20  ;;  %2942 = vmatprep.subr.bf16.mxu0 %v4063_v21  ;;  %v4115_v19 = vld [vmem:[%s5801_s3 + $0x608] ss:$24 sps:$4 sm:$0xff]   ;;  %v4120_v20 = vld [vmem:[%s5801_s3 + $0x634] ss:$24 sps:$4 sm:$0xff]  }
 0x147   : > { %v4123_v21 = vld [vmem:[%s5801_s3 + $0x63c] ss:$24 sps:$4 sm:$0xff]  }
 0x149   : > { %2814 = vmatpush1.bf16.msra.mxu1 %v4058_v22  ;;  %2943 = vmatpush1.bf16.msra.mxu0 %v4061_v23  ;;  %v4118_v22 = vld [vmem:[%s5801_s3 + $0x630] ss:$24 sps:$4 sm:$0xff]  }
 0x14a   : > { %2815 = vmatprep.subr.bf16.mxu1 %v4066_v24  ;;  %2944 = vmatprep.subr.bf16.mxu0 %v4069_v25  ;;  %v4121_v23 = vld [vmem:[%s5801_s3 + $0x638] ss:$24 sps:$4 sm:$0xff]   ;;  %v4126_v24 = vld [vmem:[%s5801_s3 + $0x664] ss:$24 sps:$4 sm:$0xff]  }
 0x14b   : > { %v4129_v25 = vld [vmem:[%s5801_s3 + $0x66c] ss:$24 sps:$4 sm:$0xff]  }
 0x14d   : > { %2816 = vmatpush1.bf16.msra.mxu1 %v4064_v26  ;;  %2945 = vmatpush1.bf16.msra.mxu0 %v4067_v27  ;;  %v4124_v26 = vld [vmem:[%s5801_s3 + $0x660] ss:$24 sps:$4 sm:$0xff]  }
 0x14e   : > { %2817 = vmatprep.subr.bf16.mxu1 %v4072_v28  ;;  %2946 = vmatprep.subr.bf16.mxu0 %v4075_v29  ;;  %v4127_v27 = vld [vmem:[%s5801_s3 + $0x668] ss:$24 sps:$4 sm:$0xff]   ;;  %v4132_v28 = vld [vmem:[%s5801_s3 + $0x694] ss:$24 sps:$4 sm:$0xff]  }
 0x14f   : > { %v4135_v29 = vld [vmem:[%s5801_s3 + $0x69c] ss:$24 sps:$4 sm:$0xff]  }
 0x151   : > { %2818 = vmatpush1.bf16.msra.mxu1 %v4070_v30  ;;  %2947 = vmatpush1.bf16.msra.mxu0 %v4073_v31  ;;  %v4130_v30 = vld [vmem:[%s5801_s3 + $0x690] ss:$24 sps:$4 sm:$0xff]  }
 0x152   : > { %2819 = vmatprep.subr.bf16.mxu1 %v4078_v32  ;;  %2948 = vmatprep.subr.bf16.mxu0 %v4081_v33  ;;  %v4133_v31 = vld [vmem:[%s5801_s3 + $0x698] ss:$24 sps:$4 sm:$0xff]   ;;  %v4138_v32 = vld [vmem:[%s5801_s3 + $0x6c4] ss:$24 sps:$4 sm:$0xff]  }
 0x153   : > { %v4141_v33 = vld [vmem:[%s5801_s3 + $0x6cc] ss:$24 sps:$4 sm:$0xff]  }
 0x155   : > { %2820 = vmatpush1.bf16.msra.mxu1 %v4076_v35  ;;  %2949 = vmatpush1.bf16.msra.mxu0 %v4079_v36  ;;  %v4136_v35 = vld [vmem:[%s5801_s3 + $0x6c0] ss:$24 sps:$4 sm:$0xff]  }
 0x156   : > { %2821 = vmatprep.subr.bf16.mxu1 %v4084_v37  ;;  %2950 = vmatprep.subr.bf16.mxu0 %v4087_v38  ;;  %v4139_v36 = vld [vmem:[%s5801_s3 + $0x6c8] ss:$24 sps:$4 sm:$0xff]   ;;  %v4144_v37 = vld [vmem:[%s5801_s3 + $0x6f4] ss:$24 sps:$4 sm:$0xff]  }
 0x157   : > { %v4147_v38 = vld [vmem:[%s5801_s3 + $0x6fc] ss:$24 sps:$4 sm:$0xff]  }
 0x159   : > { %2822 = vmatpush1.bf16.msra.mxu1 %v4082_v42  ;;  %2951 = vmatpush1.bf16.msra.mxu0 %v4085_v43  ;;  %v4142_v42 = vld [vmem:[%s5801_s3 + $0x6f0] ss:$24 sps:$4 sm:$0xff]  }
 0x15a   : > { %2823 = vmatprep.subr.bf16.mxu1 %v4090_v44  ;;  %2952 = vmatprep.subr.bf16.mxu0 %v4093_v45  ;;  %v4145_v43 = vld [vmem:[%s5801_s3 + $0x6f8] ss:$24 sps:$4 sm:$0xff]   ;;  %v4150_v44 = vld [vmem:[%s5801_s3 + $0x724] ss:$24 sps:$4 sm:$0xff]  }
 0x15b   : > { %v4153_v45 = vld [vmem:[%s5801_s3 + $0x72c] ss:$24 sps:$4 sm:$0xff]  }
 0x15d   : > { %2824 = vmatpush1.bf16.msra.mxu1 %v4088_v46  ;;  %2953 = vmatpush1.bf16.msra.mxu0 %v4091_v47  ;;  %v4148_v46 = vld [vmem:[%s5801_s3 + $0x720] ss:$24 sps:$4 sm:$0xff]  }
 0x15e   : > { %2825 = vmatprep.subr.bf16.mxu1 %v4096_v48  ;;  %2954 = vmatprep.subr.bf16.mxu0 %v4099_v49  ;;  %v4151_v47 = vld [vmem:[%s5801_s3 + $0x728] ss:$24 sps:$4 sm:$0xff]   ;;  %v4156_v48 = vld [vmem:[%s5801_s3 + $0x754] ss:$24 sps:$4 sm:$0xff]  }
 0x15f   : > { %v4159_v49 = vld [vmem:[%s5801_s3 + $0x75c] ss:$24 sps:$4 sm:$0xff]  }
 0x161   : > { %2826 = vmatpush1.bf16.msra.mxu1 %v4094_v52  ;;  %v926_v60 = vpop.f32.mrb[4].mxu0  ;;  %2955 = vmatpush1.bf16.msra.mxu0 %v4097_v53  ;;  %v4154_v52 = vld [vmem:[%s5801_s3 + $0x750] ss:$24 sps:$4 sm:$0xff]  }
 0x162   : > { %v927_v63 = vadd.f32 %v926_v60, %v340_v54  ;;  %v928_v0 = vpop.f32.mrb[5].mxu0  ;;  %2827 = vmatprep.subr.bf16.mxu1 %v4102_v55  ;;  %2956 = vmatprep.subr.bf16.mxu0 %v4105_v58  ;;  %v4157_v53 = vld [vmem:[%s5801_s3 + $0x758] ss:$24 sps:$4 sm:$0xff]   ;;  %v4165_v55 = vld [vmem:[%s5801_s3 + $0x78c] ss:$24 sps:$4 sm:$0xff]  }
 0x163   : > { %v929_v3 = vadd.f32 %v928_v0, %v344_v59  ;;  %v930_v4 = vpop.f32.mrb[6].mxu0  ;;  %v4160_v58 = vld [vmem:[%s5801_s3 + $0x780] ss:$24 sps:$4 sm:$0xff]   ;;  %v4168_v60 = vld [vmem:[%s5801_s3 + $0x7b4] ss:$24 sps:$4 sm:$0xff]  }
 0x164   : > { %v931_v5 = vadd.f32 %v930_v4, %v340_v54  ;;  %v932_v6 = vpop.f32.mrb[7].mxu0  ;;  %v980_v34 = vmax.f32 %v927_v63, 0.0  ;;  %v4162_v54 = vld [vmem:[%s5801_s3 + $0x784] ss:$24 sps:$4 sm:$0xff]   ;;  %v4169_v63 = vld [vmem:[%s5801_s3 + $0x7b8] ss:$24 sps:$4 sm:$0xff]  }
 0x165   : > { %v933_v7 = vadd.f32 %v932_v6, %v344_v59  ;;  %2828 = vmatpush1.bf16.msra.mxu1 %v4100_v61  ;;  %2957 = vmatpush1.bf16.msra.mxu0 %v4103_v62  ;;  %v981_v14 = vmax.f32 %v929_v3, 0.0  ;;  %v4163_v59 = vld [vmem:[%s5801_s3 + $0x788] ss:$24 sps:$4 sm:$0xff]   ;;  %v4171_v61 = vld [vmem:[%s5801_s3 + $0x7bc] ss:$24 sps:$4 sm:$0xff]  }
 0x166   : > { %v986_v10 = vmax.f32 %v931_v5, 0.0  ;;  %2829 = vmatprep.subr.bf16.mxu1 %v4108_v1  ;;  %2958 = vmatprep.subr.bf16.mxu0 %v4111_v2  ;;  %v4166_v62 = vld [vmem:[%s5801_s3 + $0x7b0] ss:$24 sps:$4 sm:$0xff]   ;;  %v4174_v0 = vld [vmem:[%s5801_s3 + $0x7e4] ss:$24 sps:$4 sm:$0xff]  }
 0x167   : > { %v987_v15 = vmax.f32 %v933_v7, 0.0  ;;  %v4177_v1 = vld [vmem:[%s5801_s3 + $0x7ec] ss:$24 sps:$4 sm:$0xff]   ;;  %v4172_v2 = vld [vmem:[%s5801_s3 + $0x7e0] ss:$24 sps:$4 sm:$0xff]  }
 0x168   : > { %v5225_v16 = vpack.c.bf16 %v986_v10, %v980_v34  ;;  %v4175_v3 = vld [vmem:[%s5801_s3 + $0x7e8] ss:$24 sps:$4 sm:$0xff]   ;;  %v4180_v4 = vld [vmem:[%s5801_s3 + $0x814] ss:$24 sps:$4 sm:$0xff]   ;;  %v4181_v7 = vld [vmem:[%s5801_s3 + $0x818] ss:$24 sps:$4 sm:$0xff]  }
 0x169   : > { %v5227_v17 = vpack.c.bf16 %v987_v15, %v981_v14  ;;  %2830 = vmatpush1.bf16.msra.mxu1 %v4106_v8  ;;  %2959 = vmatpush1.bf16.msra.mxu0 %v4109_v9  ;;  %v4183_v5 = vld [vmem:[%s5801_s3 + $0x81c] ss:$24 sps:$4 sm:$0xff]   ;;  %v4178_v6 = vld [vmem:[%s5801_s3 + $0x810] ss:$24 sps:$4 sm:$0xff]   ;;  %v4189_v9 = vld [vmem:[%s5801_s3 + $0x84c] ss:$24 sps:$4 sm:$0xff]  }
 0x16a   : > { %2842 = vmatprep.subr.bf16.mxu1 %v4114_v11  ;;  %2971 = vmatprep.subr.bf16.mxu0 %v4117_v12  ;;  %v4186_v8 = vld [vmem:[%s5801_s3 + $0x844] ss:$24 sps:$4 sm:$0xff]   ;;  %v4184_v34 = vld [vmem:[%s5801_s3 + $0x840] ss:$24 sps:$4 sm:$0xff]   ;;  %v4192_v11 = vld [vmem:[%s5801_s3 + $0x874] ss:$24 sps:$4 sm:$0xff]  }
 0x16b   : > { %2831 = vmatprep.mubr.bf16.mxu1 %v5227_v17  ;;  %2960 = vmatprep.mubr.bf16.mxu0 %v5227_v17  ;;  %v4187_v10 = vld [vmem:[%s5801_s3 + $0x848] ss:$24 sps:$4 sm:$0xff]   ;;  %v4195_v12 = vld [vmem:[%s5801_s3 + $0x87c] ss:$24 sps:$4 sm:$0xff]   ;;  %v347_v14 = vsub.s32 4, %v5002_v39  ;;  %v351_v15 = vsub.s32 5, %v5002_v39 }
 0x16c   : > { %2832 = vmatmul.mubr.bf16.vlgmr.msra.gmra.mrb[0].mxu1 %v5225_v16  ;;  %2961 = vmatmul.mubr.bf16.vlgmr.msra.gmra.mrb[12].mxu0 %v5225_v16 }
 0x16d   : > { %2843 = vmatpush1.bf16.msra.mxu1 %v4112_v18  ;;  %2972 = vmatpush1.bf16.msra.mxu0 %v4115_v19  ;;  %v4190_v18 = vld [vmem:[%s5801_s3 + $0x870] ss:$24 sps:$4 sm:$0xff]  }
 0x16e   : > { %2844 = vmatprep.subr.bf16.mxu1 %v4120_v20  ;;  %2973 = vmatprep.subr.bf16.mxu0 %v4123_v21  ;;  %v4193_v19 = vld [vmem:[%s5801_s3 + $0x878] ss:$24 sps:$4 sm:$0xff]   ;;  %v348_v20 = vrot.slane %v5008_v13, %v347_v14  ;;  %v4198_v21 = vld [vmem:[%s5801_s3 + $0x8a4] ss:$24 sps:$4 sm:$0xff]  }
 0x171   : > { %2845 = vmatpush1.bf16.msra.mxu1 %v4118_v22  ;;  %2974 = vmatpush1.bf16.msra.mxu0 %v4121_v23  ;;  %v4201_v22 = vld [vmem:[%s5801_s3 + $0x8ac] ss:$24 sps:$4 sm:$0xff]   ;;  %v352_v23 = vrot.slane %v5008_v13, %v351_v15  ;;  %v4207_v13 = vld [vmem:[%s5801_s3 + $0x8dc] ss:$24 sps:$4 sm:$0xff]  }
 0x172   : > { %2846 = vmatprep.subr.bf16.mxu1 %v4126_v24  ;;  %2975 = vmatprep.subr.bf16.mxu0 %v4129_v25  ;;  %v4196_v25 = vld [vmem:[%s5801_s3 + $0x8a0] ss:$24 sps:$4 sm:$0xff]  }
 0x175   : > { %2847 = vmatpush1.bf16.msra.mxu1 %v4124_v26  ;;  %2976 = vmatpush1.bf16.msra.mxu0 %v4127_v27  ;;  %v4199_v26 = vld [vmem:[%s5801_s3 + $0x8a8] ss:$24 sps:$4 sm:$0xff]  }
 0x176   : > { %2848 = vmatprep.subr.bf16.mxu1 %v4132_v28  ;;  %2977 = vmatprep.subr.bf16.mxu0 %v4135_v29  ;;  %v4204_v29 = vld [vmem:[%s5801_s3 + $0x8d4] ss:$24 sps:$4 sm:$0xff]  }
 0x179   : > { %2849 = vmatpush1.bf16.msra.mxu1 %v4130_v30  ;;  %2978 = vmatpush1.bf16.msra.mxu0 %v4133_v31 }
 0x17a   : > { %2850 = vmatprep.subr.bf16.mxu1 %v4138_v32  ;;  %2979 = vmatprep.subr.bf16.mxu0 %v4141_v33 }
 0x17d   : > { %2851 = vmatpush1.bf16.msra.mxu1 %v4136_v35  ;;  %2980 = vmatpush1.bf16.msra.mxu0 %v4139_v36  ;;  %v4202_v36 = vld [vmem:[%s5801_s3 + $0x8d0] ss:$24 sps:$4 sm:$0xff]  }
 0x17e   : > { %2852 = vmatprep.subr.bf16.mxu1 %v4144_v37  ;;  %2981 = vmatprep.subr.bf16.mxu0 %v4147_v38  ;;  %v4205_v37 = vld [vmem:[%s5801_s3 + $0x8d8] ss:$24 sps:$4 sm:$0xff]  }
 0x181   : > { %2853 = vmatpush1.bf16.msra.mxu1 %v4142_v42  ;;  %2982 = vmatpush1.bf16.msra.mxu0 %v4145_v43  ;;  %v4210_v43 = vld [vmem:[%s5801_s3 + $0x14] ss:$24 sps:$4 sm:$0xff]  }
 0x182   : > { %2854 = vmatprep.subr.bf16.mxu1 %v4150_v44  ;;  %2983 = vmatprep.subr.bf16.mxu0 %v4153_v45 }
 0x185   : > { %2855 = vmatpush1.bf16.msra.mxu1 %v4148_v46  ;;  %2984 = vmatpush1.bf16.msra.mxu0 %v4151_v47 }
 0x186   : > { %2856 = vmatprep.subr.bf16.mxu1 %v4156_v48  ;;  %2985 = vmatprep.subr.bf16.mxu0 %v4159_v49  ;;  %v4208_v48 = vld [vmem:[%s5801_s3 + $0x10] ss:$24 sps:$4 sm:$0xff]   ;;  %v4213_v49 = vld [vmem:[%s5801_s3 + $0x44] ss:$24 sps:$4 sm:$0xff]  }
 0x189   : > { %2857 = vmatpush1.bf16.msra.mxu1 %v4154_v52  ;;  %2986 = vmatpush1.bf16.msra.mxu0 %v4157_v53  ;;  %v4211_v52 = vld [vmem:[%s5801_s3 + $0x40] ss:$24 sps:$4 sm:$0xff]   ;;  %v4216_v53 = vld [vmem:[%s5801_s3 + $0x74] ss:$24 sps:$4 sm:$0xff]  }
 0x18a   : > { %2858 = vmatprep.subr.bf16.mxu1 %v4162_v54  ;;  %2987 = vmatprep.subr.bf16.mxu0 %v4165_v55  ;;  %v4214_v54 = vld [vmem:[%s5801_s3 + $0x70] ss:$24 sps:$4 sm:$0xff]   ;;  %v4219_v55 = vld [vmem:[%s5801_s3 + $0xa4] ss:$24 sps:$4 sm:$0xff]  }
 0x18d   : > { %2859 = vmatpush1.bf16.msra.mxu1 %v4160_v58  ;;  %2988 = vmatpush1.bf16.msra.mxu0 %v4163_v59  ;;  %v4222_v58 = vld [vmem:[%s5801_s3 + $0xd4] ss:$24 sps:$4 sm:$0xff]   ;;  %v4220_v59 = vld [vmem:[%s5801_s3 + $0xd0] ss:$24 sps:$4 sm:$0xff]  }
 0x18e   : > { %2860 = vmatprep.subr.bf16.mxu1 %v4168_v60  ;;  %2989 = vmatprep.subr.bf16.mxu0 %v4171_v61  ;;  %v4225_v60 = vld [vmem:[%s5801_s3 + $0x104] ss:$24 sps:$4 sm:$0xff]   ;;  %v4223_v61 = vld [vmem:[%s5801_s3 + $0x100] ss:$24 sps:$4 sm:$0xff]  }
 0x191   : > { %2861 = vmatpush1.bf16.msra.mxu1 %v4166_v62  ;;  %2990 = vmatpush1.bf16.msra.mxu0 %v4169_v63  ;;  %v4228_v62 = vld [vmem:[%s5801_s3 + $0x134] ss:$24 sps:$4 sm:$0xff]   ;;  %v4226_v63 = vld [vmem:[%s5801_s3 + $0x130] ss:$24 sps:$4 sm:$0xff]  }
 0x192   : > { %2862 = vmatprep.subr.bf16.mxu1 %v4174_v0  ;;  %2991 = vmatprep.subr.bf16.mxu0 %v4177_v1  ;;  %v4231_v0 = vld [vmem:[%s5801_s3 + $0x164] ss:$24 sps:$4 sm:$0xff]   ;;  %v4229_v1 = vld [vmem:[%s5801_s3 + $0x160] ss:$24 sps:$4 sm:$0xff]  }
 0x195   : > { %2863 = vmatpush1.bf16.msra.mxu1 %v4172_v2  ;;  %2992 = vmatpush1.bf16.msra.mxu0 %v4175_v3  ;;  %v4234_v2 = vld [vmem:[%s5801_s3 + $0x194] ss:$24 sps:$4 sm:$0xff]   ;;  %v4232_v3 = vld [vmem:[%s5801_s3 + $0x190] ss:$24 sps:$4 sm:$0xff]  }
 0x196   : > { %2864 = vmatprep.subr.bf16.mxu1 %v4180_v4  ;;  %2993 = vmatprep.subr.bf16.mxu0 %v4183_v5  ;;  %v4237_v4 = vld [vmem:[%s5801_s3 + $0x1c4] ss:$24 sps:$4 sm:$0xff]   ;;  %v4235_v5 = vld [vmem:[%s5801_s3 + $0x1c0] ss:$24 sps:$4 sm:$0xff]  }
 0x199   : > { %2865 = vmatpush1.bf16.msra.mxu1 %v4178_v6  ;;  %2994 = vmatpush1.bf16.msra.mxu0 %v4181_v7  ;;  %v4240_v6 = vld [vmem:[%s5801_s3 + $0x1f4] ss:$24 sps:$4 sm:$0xff]   ;;  %v4238_v7 = vld [vmem:[%s5801_s3 + $0x1f0] ss:$24 sps:$4 sm:$0xff]  }
 0x19a   : > { %2866 = vmatprep.subr.bf16.mxu1 %v4186_v8  ;;  %2995 = vmatprep.subr.bf16.mxu0 %v4189_v9  ;;  %v4243_v8 = vld [vmem:[%s5801_s3 + $0x224] ss:$24 sps:$4 sm:$0xff]   ;;  %v4241_v9 = vld [vmem:[%s5801_s3 + $0x220] ss:$24 sps:$4 sm:$0xff]  }
 0x19d   : > { %2867 = vmatpush1.bf16.msra.mxu1 %v4184_v34  ;;  %2996 = vmatpush1.bf16.msra.mxu0 %v4187_v10  ;;  %v4246_v34 = vld [vmem:[%s5801_s3 + $0x254] ss:$24 sps:$4 sm:$0xff]   ;;  %v4244_v10 = vld [vmem:[%s5801_s3 + $0x250] ss:$24 sps:$4 sm:$0xff]  }
 0x19e   : > { %2868 = vmatprep.subr.bf16.mxu1 %v4192_v11  ;;  %2997 = vmatprep.subr.bf16.mxu0 %v4195_v12  ;;  %v4249_v11 = vld [vmem:[%s5801_s3 + $0x284] ss:$24 sps:$4 sm:$0xff]   ;;  %v4247_v12 = vld [vmem:[%s5801_s3 + $0x280] ss:$24 sps:$4 sm:$0xff]  }
 0x1a1   : > { %2869 = vmatpush1.bf16.msra.mxu1 %v4190_v18  ;;  %v969_v24 = vpop.f32.mrb[8].mxu0  ;;  %2998 = vmatpush1.bf16.msra.mxu0 %v4193_v19  ;;  %v4252_v18 = vld [vmem:[%s5801_s3 + $0x2b4] ss:$24 sps:$4 sm:$0xff]   ;;  %v4250_v19 = vld [vmem:[%s5801_s3 + $0x2b0] ss:$24 sps:$4 sm:$0xff]  }
 0x1a2   : > { %v970_v27 = vadd.f32 %v969_v24, %v348_v20  ;;  %v971_v28 = vpop.f32.mrb[9].mxu0  ;;  %2870 = vmatprep.subr.bf16.mxu1 %v4198_v21  ;;  %2999 = vmatprep.subr.bf16.mxu0 %v4201_v22  ;;  %v4253_v21 = vld [vmem:[%s5801_s3 + $0x2e0] ss:$24 sps:$4 sm:$0xff]   ;;  %v4258_v22 = vld [vmem:[%s5801_s3 + $0x314] ss:$24 sps:$4 sm:$0xff]  }
 0x1a3   : > { %v972_v30 = vadd.f32 %v971_v28, %v352_v23  ;;  %v973_v31 = vpop.f32.mrb[10].mxu0  ;;  %v4261_v24 = vld [vmem:[%s5801_s3 + $0x344] ss:$24 sps:$4 sm:$0xff]   ;;  %v4270_v28 = vld [vmem:[%s5801_s3 + $0x3d4] ss:$24 sps:$4 sm:$0xff]  }
 0x1a4   : > { %v974_v32 = vadd.f32 %v973_v31, %v348_v20  ;;  %v975_v33 = vpop.f32.mrb[11].mxu0  ;;  %v982_v38 = vmax.f32 %v970_v27, 0.0  ;;  %v4255_v20 = vld [vmem:[%s5801_s3 + $0x2e4] ss:$24 sps:$4 sm:$0xff]   ;;  %v4262_v27 = vld [vmem:[%s5801_s3 + $0x370] ss:$24 sps:$4 sm:$0xff]  }
 0x1a5   : > { %v976_v35 = vadd.f32 %v975_v33, %v352_v23  ;;  %2871 = vmatpush1.bf16.msra.mxu1 %v4196_v25  ;;  %3000 = vmatpush1.bf16.msra.mxu0 %v4199_v26  ;;  %v983_v44 = vmax.f32 %v972_v30, 0.0  ;;  %v4256_v23 = vld [vmem:[%s5801_s3 + $0x310] ss:$24 sps:$4 sm:$0xff]   ;;  %v4259_v25 = vld [vmem:[%s5801_s3 + $0x340] ss:$24 sps:$4 sm:$0xff]  }
 0x1a6   : > { %v988_v42 = vmax.f32 %v974_v32, 0.0  ;;  %2872 = vmatprep.subr.bf16.mxu1 %v4204_v29  ;;  %3001 = vmatprep.subr.bf16.mxu0 %v4207_v13  ;;  %v4264_v26 = vld [vmem:[%s5801_s3 + $0x374] ss:$24 sps:$4 sm:$0xff]   ;;  %v4268_v29 = vld [vmem:[%s5801_s3 + $0x3d0] ss:$24 sps:$4 sm:$0xff]  }
 0x1a7   : > { %v989_v45 = vmax.f32 %v976_v35, 0.0  ;;  %v4273_v13 = vld [vmem:[%s5801_s3 + $0x404] ss:$24 sps:$4 sm:$0xff]   ;;  %v4271_v30 = vld [vmem:[%s5801_s3 + $0x400] ss:$24 sps:$4 sm:$0xff]  }
 0x1a8   : > { %v5430_v46 = vpack.c.bf16 %v988_v42, %v982_v38  ;;  %v4276_v31 = vld [vmem:[%s5801_s3 + $0x434] ss:$24 sps:$4 sm:$0xff]   ;;  %v4274_v32 = vld [vmem:[%s5801_s3 + $0x430] ss:$24 sps:$4 sm:$0xff]   ;;  %v4279_v33 = vld [vmem:[%s5801_s3 + $0x464] ss:$24 sps:$4 sm:$0xff]  }
 0x1a9   : > { %v5432_v47 = vpack.c.bf16 %v989_v45, %v983_v44  ;;  %2873 = vmatpush1.bf16.msra.mxu1 %v4202_v36  ;;  %3002 = vmatpush1.bf16.msra.mxu0 %v4205_v37  ;;  %v4277_v35 = vld [vmem:[%s5801_s3 + $0x460] ss:$24 sps:$4 sm:$0xff]   ;;  %v4282_v36 = vld [vmem:[%s5801_s3 + $0x494] ss:$24 sps:$4 sm:$0xff]   ;;  %v4280_v37 = vld [vmem:[%s5801_s3 + $0x490] ss:$24 sps:$4 sm:$0xff]  }
 0x1aa   : > { %3014 = vmatprep.subr.bf16.mxu1 %v4210_v43  ;;  %v4285_v38 = vld [vmem:[%s5801_s3 + $0x4c4] ss:$24 sps:$4 sm:$0xff]   ;;  %v4283_v42 = vld [vmem:[%s5801_s3 + $0x4c0] ss:$24 sps:$4 sm:$0xff]   ;;  %v4288_v43 = vld [vmem:[%s5801_s3 + $0x4f4] ss:$24 sps:$4 sm:$0xff]  }
 0x1ab   : > { %2874 = vmatprep.mubr.bf16.mxu1 %v5432_v47  ;;  %3003 = vmatprep.mubr.bf16.mxu0 %v5432_v47  ;;  %v4286_v44 = vld [vmem:[%s5801_s3 + $0x4f0] ss:$24 sps:$4 sm:$0xff]   ;;  %v4291_v45 = vld [vmem:[%s5801_s3 + $0x524] ss:$24 sps:$4 sm:$0xff]  }
 0x1ac   : > { %2875 = vmatmul.mubr.bf16.vlgmr.msra.gmra.mrb[0].mxu1 %v5430_v46  ;;  %3004 = vmatmul.mubr.bf16.vlgmr.msra.gmra.mrb[12].mxu0 %v5430_v46 }
 0x1ad   : > { %3015 = vmatpush1.bf16.msra.mxu1 %v4208_v48  ;;  %3046 = vmatprep.mubr.bf16.mxu1 %v5019_v57  ;;  %v4217_v57 = vld [vmem:[%s5801_s3 + $0xa0] ss:$24 sps:$4 sm:$0xff]  }
 0x1ae   : > { %3016 = vmatprep.subr.bf16.mxu1 %v4213_v49  ;;  %v4289_v48 = vld [vmem:[%s5801_s3 + $0x520] ss:$24 sps:$4 sm:$0xff]   ;;  %v4294_v49 = vld [vmem:[%s5801_s3 + $0x554] ss:$24 sps:$4 sm:$0xff]  }
 0x1b1   : > { %3017 = vmatpush1.bf16.msra.mxu1 %v4211_v52  ;;  %v4292_v52 = vld [vmem:[%s5801_s3 + $0x550] ss:$24 sps:$4 sm:$0xff]  }
 0x1b2   : > { %3018 = vmatprep.subr.bf16.mxu1 %v4216_v53  ;;  %v4297_v53 = vld [vmem:[%s5801_s3 + $0x584] ss:$24 sps:$4 sm:$0xff]  }
 0x1b5   : > { %3019 = vmatpush1.bf16.msra.mxu1 %v4214_v54  ;;  %v4295_v54 = vld [vmem:[%s5801_s3 + $0x580] ss:$24 sps:$4 sm:$0xff]  }
 0x1b6   : > { %3020 = vmatprep.subr.bf16.mxu1 %v4219_v55  ;;  %v4300_v55 = vld [vmem:[%s5801_s3 + $0x5b4] ss:$24 sps:$4 sm:$0xff]  }
 0x1b9   : > { %3021 = vmatpush1.bf16.msra.mxu1 %v4217_v57  ;;  %v4298_v57 = vld [vmem:[%s5801_s3 + $0x5b0] ss:$24 sps:$4 sm:$0xff]  }
 0x1ba   : > { %3022 = vmatprep.subr.bf16.mxu1 %v4222_v58  ;;  %v4303_v58 = vld [vmem:[%s5801_s3 + $0x5e4] ss:$24 sps:$4 sm:$0xff]  }
 0x1bd   : > { %3023 = vmatpush1.bf16.msra.mxu1 %v4220_v59  ;;  %v4301_v59 = vld [vmem:[%s5801_s3 + $0x5e0] ss:$24 sps:$4 sm:$0xff]  }
 0x1be   : > { %3024 = vmatprep.subr.bf16.mxu1 %v4225_v60  ;;  %v4306_v60 = vld [vmem:[%s5801_s3 + $0x614] ss:$24 sps:$4 sm:$0xff]  }
 0x1c1   : > { %3025 = vmatpush1.bf16.msra.mxu1 %v4223_v61  ;;  %v4304_v61 = vld [vmem:[%s5801_s3 + $0x610] ss:$24 sps:$4 sm:$0xff]  }
 0x1c2   : > { %3026 = vmatprep.subr.bf16.mxu1 %v4228_v62  ;;  %v4309_v62 = vld [vmem:[%s5801_s3 + $0x644] ss:$24 sps:$4 sm:$0xff]  }
 0x1c5   : > { %3027 = vmatpush1.bf16.msra.mxu1 %v4226_v63  ;;  %v4307_v63 = vld [vmem:[%s5801_s3 + $0x640] ss:$24 sps:$4 sm:$0xff]  }
 0x1c6   : > { %3028 = vmatprep.subr.bf16.mxu1 %v4231_v0  ;;  %v4312_v0 = vld [vmem:[%s5801_s3 + $0x674] ss:$24 sps:$4 sm:$0xff]  }
 0x1c9   : > { %3029 = vmatpush1.bf16.msra.mxu1 %v4229_v1  ;;  %v4310_v1 = vld [vmem:[%s5801_s3 + $0x670] ss:$24 sps:$4 sm:$0xff]  }
 0x1ca   : > { %3030 = vmatprep.subr.bf16.mxu1 %v4234_v2  ;;  %v4318_v2 = vld [vmem:[%s5801_s3 + $0x6d4] ss:$24 sps:$4 sm:$0xff]  }
 0x1cd   : > { %3031 = vmatpush1.bf16.msra.mxu1 %v4232_v3  ;;  %v4316_v3 = vld [vmem:[%s5801_s3 + $0x6d0] ss:$24 sps:$4 sm:$0xff]  }
 0x1ce   : > { %3032 = vmatprep.subr.bf16.mxu1 %v4237_v4  ;;  %v4321_v4 = vld [vmem:[%s5801_s3 + $0x704] ss:$24 sps:$4 sm:$0xff]  }
 0x1d1   : > { %3033 = vmatpush1.bf16.msra.mxu1 %v4235_v5  ;;  %v4319_v5 = vld [vmem:[%s5801_s3 + $0x700] ss:$24 sps:$4 sm:$0xff]  }
 0x1d2   : > { %3034 = vmatprep.subr.bf16.mxu1 %v4240_v6  ;;  %v4324_v6 = vld [vmem:[%s5801_s3 + $0x734] ss:$24 sps:$4 sm:$0xff]  }
 0x1d5   : > { %3035 = vmatpush1.bf16.msra.mxu1 %v4238_v7  ;;  %v4322_v7 = vld [vmem:[%s5801_s3 + $0x730] ss:$24 sps:$4 sm:$0xff]  }
 0x1d6   : > { %3036 = vmatprep.subr.bf16.mxu1 %v4243_v8  ;;  %v4327_v8 = vld [vmem:[%s5801_s3 + $0x764] ss:$24 sps:$4 sm:$0xff]  }
 0x1d9   : > { %3037 = vmatpush1.bf16.msra.mxu1 %v4241_v9  ;;  %v4325_v9 = vld [vmem:[%s5801_s3 + $0x760] ss:$24 sps:$4 sm:$0xff]  }
 0x1da   : > { %3038 = vmatprep.subr.bf16.mxu1 %v4246_v34  ;;  %v4330_v34 = vld [vmem:[%s5801_s3 + $0x794] ss:$24 sps:$4 sm:$0xff]  }
 0x1dd   : > { %3039 = vmatpush1.bf16.msra.mxu1 %v4244_v10  ;;  %v4328_v10 = vld [vmem:[%s5801_s3 + $0x790] ss:$24 sps:$4 sm:$0xff]  }
 0x1de   : > { %3040 = vmatprep.subr.bf16.mxu1 %v4249_v11  ;;  %v4333_v11 = vld [vmem:[%s5801_s3 + $0x7c4] ss:$24 sps:$4 sm:$0xff]  }
 0x1e1   : > { %3041 = vmatpush1.bf16.msra.mxu1 %v4247_v12  ;;  %v4331_v12 = vld [vmem:[%s5801_s3 + $0x7c0] ss:$24 sps:$4 sm:$0xff]  }
 0x1e2   : > { %3042 = vmatprep.subr.bf16.mxu1 %v4252_v18  ;;  %v4336_v18 = vld [vmem:[%s5801_s3 + $0x7f4] ss:$24 sps:$4 sm:$0xff]  }
 0x1e5   : > { %3043 = vmatpush1.bf16.msra.mxu1 %v4250_v19  ;;  %v4334_v19 = vld [vmem:[%s5801_s3 + $0x7f0] ss:$24 sps:$4 sm:$0xff]  }
 0x1e6   : > { %3044 = vmatprep.subr.bf16.mxu1 %v4255_v20  ;;  %v4339_v20 = vld [vmem:[%s5801_s3 + $0x824] ss:$24 sps:$4 sm:$0xff]  }
 0x1e9   : > { %3045 = vmatpush1.bf16.msra.mxu1 %v4253_v21  ;;  %v4337_v21 = vld [vmem:[%s5801_s3 + $0x820] ss:$24 sps:$4 sm:$0xff]  }
 0x1ea   : > { %3057 = vmatprep.subr.bf16.mxu1 %v4258_v22  ;;  %v4342_v22 = vld [vmem:[%s5801_s3 + $0x854] ss:$24 sps:$4 sm:$0xff]  }
 0x1ec   : > { %3047 = vmatmul.mubr.bf16.vlgmr.msra.gmra.mrb[4].mxu1 %v5017_v56  ;;  %v4267_v56 = vld [vmem:[%s5801_s3 + $0x3a4] ss:$24 sps:$4 sm:$0xff]  }
 0x1ed   : > { %3058 = vmatpush1.bf16.msra.mxu1 %v4256_v23  ;;  %3089 = vmatprep.mubr.bf16.mxu1 %v5227_v17  ;;  %v4265_v17 = vld [vmem:[%s5801_s3 + $0x3a0] ss:$24 sps:$4 sm:$0xff]   ;;  %v4340_v23 = vld [vmem:[%s5801_s3 + $0x850] ss:$24 sps:$4 sm:$0xff]  }
 0x1ee   : > { %3059 = vmatprep.subr.bf16.mxu1 %v4261_v24  ;;  %v4345_v24 = vld [vmem:[%s5801_s3 + $0x884] ss:$24 sps:$4 sm:$0xff]  }
 0x1f1   : > { %3060 = vmatpush1.bf16.msra.mxu1 %v4259_v25  ;;  %v4343_v25 = vld [vmem:[%s5801_s3 + $0x880] ss:$24 sps:$4 sm:$0xff]  }
 0x1f2   : > { %3061 = vmatprep.subr.bf16.mxu1 %v4264_v26  ;;  %v4348_v26 = vld [vmem:[%s5801_s3 + $0x8b4] ss:$24 sps:$4 sm:$0xff]  }
 0x1f5   : > { %3062 = vmatpush1.bf16.msra.mxu1 %v4262_v27  ;;  %v4346_v27 = vld [vmem:[%s5801_s3 + $0x8b0] ss:$24 sps:$4 sm:$0xff]  }
 0x1f6   : > { %3063 = vmatprep.subr.bf16.mxu1 %v4267_v56  ;;  %v4351_v56 = vld [vmem:[%s5801_s3 + $0x8e4] ss:$24 sps:$4 sm:$0xff]  }
 0x1f9   : > { %3064 = vmatpush1.bf16.msra.mxu1 %v4265_v17  ;;  %v4349_v17 = vld [vmem:[%s5801_s3 + $0x8e0] ss:$24 sps:$4 sm:$0xff]  }
 0x1fa   : > { %3065 = vmatprep.subr.bf16.mxu1 %v4270_v28  ;;  %v1284_v28 = vld [vmem:[%s5802_s4] sm:$0x3f] }
 0x1fd   : > { %3066 = vmatpush1.bf16.msra.mxu1 %v4268_v29  ;;  %v1289_v29 = vrot.slane %v1284_v28, %v331_v40 }
 0x1fe   : > { %3067 = vmatprep.subr.bf16.mxu1 %v4273_v13  ;;  %v1293_v13 = vrot.slane %v1284_v28, %v335_v41 }
 0x201   : > { %3068 = vmatpush1.bf16.msra.mxu1 %v4271_v30  ;;  %v1297_v30 = vrot.slane %v1284_v28, %v339_v50 }
 0x202   : > { %3069 = vmatprep.subr.bf16.mxu1 %v4276_v31 }
 0x205   : > { %3070 = vmatpush1.bf16.msra.mxu1 %v4274_v32 }
 0x206   : > { %3071 = vmatprep.subr.bf16.mxu1 %v4279_v33 }
 0x209   : > { %3072 = vmatpush1.bf16.msra.mxu1 %v4277_v35 }
 0x20a   : > { %3073 = vmatprep.subr.bf16.mxu1 %v4282_v36 }
 0x20d   : > { %3074 = vmatpush1.bf16.msra.mxu1 %v4280_v37 }
 0x20e   : > { %3075 = vmatprep.subr.bf16.mxu1 %v4285_v38 }
 0x211   : > { %3076 = vmatpush1.bf16.msra.mxu1 %v4283_v42 }
 0x212   : > { %3077 = vmatprep.subr.bf16.mxu1 %v4288_v43 }
 0x215   : > { %3078 = vmatpush1.bf16.msra.mxu1 %v4286_v44  ;;  %v1301_v44 = vrot.slane %v1284_v28, %v343_v51 }
 0x216   : > { %3079 = vmatprep.subr.bf16.mxu1 %v4291_v45 }
 0x219   : > { %3080 = vmatpush1.bf16.msra.mxu1 %v4289_v48 }
 0x21a   : > { %3081 = vmatprep.subr.bf16.mxu1 %v4294_v49 }
 0x21d   : > { %3082 = vmatpush1.bf16.msra.mxu1 %v4292_v52 }
 0x21e   : > { %3083 = vmatprep.subr.bf16.mxu1 %v4297_v53 }
 0x221   : > { %3084 = vmatpush1.bf16.msra.mxu1 %v4295_v54 }
 0x222   : > { %3085 = vmatprep.subr.bf16.mxu1 %v4300_v55 }
 0x225   : > { %3086 = vmatpush1.bf16.msra.mxu1 %v4298_v57 }
 0x226   : > { %3087 = vmatprep.subr.bf16.mxu1 %v4303_v58 }
 0x229   : > { %3088 = vmatpush1.bf16.msra.mxu1 %v4301_v59 }
 0x22a   : > { %3100 = vmatprep.subr.bf16.mxu1 %v4306_v60  ;;  %v1305_v60 = vrot.slane %v1284_v28, %v347_v14  ;;  %v1309_v14 = vrot.slane %v1284_v28, %v351_v15 }
 0x22c   : > { %3090 = vmatmul.mubr.bf16.vlgmr.msra.gmra.mrb[4].mxu1 %v5225_v16  ;;  %v4315_v16 = vld [vmem:[%s5801_s3 + $0x6a4] ss:$24 sps:$4 sm:$0xff]  }
 0x22d   : > { %3101 = vmatpush1.bf16.msra.mxu1 %v4304_v61  ;;  %3132 = vmatprep.mubr.bf16.mxu1 %v5432_v47  ;;  %v4313_v47 = vld [vmem:[%s5801_s3 + $0x6a0] ss:$24 sps:$4 sm:$0xff]  }
 0x22e   : > { %3102 = vmatprep.subr.bf16.mxu1 %v4309_v62 }
 0x231   : > { %3103 = vmatpush1.bf16.msra.mxu1 %v4307_v63 }
 0x232   : > { %3104 = vmatprep.subr.bf16.mxu1 %v4312_v0 }
 0x235   : > { %3105 = vmatpush1.bf16.msra.mxu1 %v4310_v1 }
 0x236   : > { %3106 = vmatprep.subr.bf16.mxu1 %v4315_v16 }
 0x239   : > { %3107 = vmatpush1.bf16.msra.mxu1 %v4313_v47 }
 0x23a   : > { %3108 = vmatprep.subr.bf16.mxu1 %v4318_v2 }
 0x23d   : > { %3109 = vmatpush1.bf16.msra.mxu1 %v4316_v3 }
 0x23e   : > { %3110 = vmatprep.subr.bf16.mxu1 %v4321_v4 }
 0x241   : > { %3111 = vmatpush1.bf16.msra.mxu1 %v4319_v5 }
 0x242   : > { %3112 = vmatprep.subr.bf16.mxu1 %v4324_v6 }
 0x245   : > { %3113 = vmatpush1.bf16.msra.mxu1 %v4322_v7 }
 0x246   : > { %3114 = vmatprep.subr.bf16.mxu1 %v4327_v8 }
 0x249   : > { %3115 = vmatpush1.bf16.msra.mxu1 %v4325_v9 }
 0x24a   : > { %3116 = vmatprep.subr.bf16.mxu1 %v4330_v34 }
 0x24d   : > { %3117 = vmatpush1.bf16.msra.mxu1 %v4328_v10 }
 0x24e   : > { %3118 = vmatprep.subr.bf16.mxu1 %v4333_v11 }
 0x251   : > { %3119 = vmatpush1.bf16.msra.mxu1 %v4331_v12 }
 0x252   : > { %3120 = vmatprep.subr.bf16.mxu1 %v4336_v18 }
 0x255   : > { %3121 = vmatpush1.bf16.msra.mxu1 %v4334_v19 }
 0x256   : > { %3122 = vmatprep.subr.bf16.mxu1 %v4339_v20 }
 0x259   : > { %3123 = vmatpush1.bf16.msra.mxu1 %v4337_v21 }
 0x25a   : > { %3124 = vmatprep.subr.bf16.mxu1 %v4342_v22 }
 0x25d   : > { %3125 = vmatpush1.bf16.msra.mxu1 %v4340_v23 }
 0x25e   : > { %3126 = vmatprep.subr.bf16.mxu1 %v4345_v24 }
 0x261   : > { %3127 = vmatpush1.bf16.msra.mxu1 %v4343_v25 }
 0x262   : > { %3128 = vmatprep.subr.bf16.mxu1 %v4348_v26 }
 0x265   : > { %3129 = vmatpush1.bf16.msra.mxu1 %v4346_v27 }
 0x266   : > { %3130 = vmatprep.subr.bf16.mxu1 %v4351_v56 }
 0x269   : > { %3131 = vmatpush1.bf16.msra.mxu1 %v4349_v17 }
 0x26c   : > { %3133 = vmatmul.mubr.bf16.vlgmr.msra.gmra.mrb[4].mxu1 %v5430_v46 }
 0x27f   : > { %v2876_v31 = vpop.f32.mrb[0].mxu1  ;;  %v3005_v32 = vpop.f32.mrb[12].mxu0 }
 0x280   : > { %v3695_v33 = vadd.f32 %v2876_v31, %v1289_v29  ;;  %v2878_v35 = vpop.f32.mrb[1].mxu1  ;;  %v3007_v36 = vpop.f32.mrb[13].mxu0  ;;  %v3699_v43 = vadd.f32 %v3005_v32, %v1297_v30 }
 0x281   : > { %v3696_v37 = vadd.f32 %v2878_v35, %v1293_v13  ;;  %v2880_v46 = vpop.f32.mrb[2].mxu1  ;;  %v3009_v38 = vpop.f32.mrb[14].mxu0  ;;  %v3700_v49 = vadd.f32 %v3007_v36, %v1301_v44 }
 0x282   : > { %v3143_v42 = vmax.f32 %v3695_v33, 0.0  ;;  %v2882_v40 = vpop.f32.mrb[3].mxu1  ;;  %v3011_v45 = vpop.f32.mrb[15].mxu0  ;;  %v3701_v41 = vadd.f32 %v3009_v38, %v1297_v30  ;;  %v3145_v50 = vmax.f32 %v3699_v43, 0.0  ;;  %v3697_v55 = vadd.f32 %v2880_v46, %v1289_v29 }
 0x283   : > { %v3144_v48 = vmax.f32 %v3696_v37, 0.0  ;;  %v3698_v53 = vadd.f32 %v2882_v40, %v1293_v13  ;;  %v3146_v54 = vmax.f32 %v3700_v49, 0.0  ;;  %v3702_v58 = vadd.f32 %v3011_v45, %v1301_v44 }
 0x284   : > { %3157 = vrot.lane.b32.xlu0 %v3143_v42, %s4416_s17  ;;  %v3151_v52 = vmax.f32 %v3701_v41, 0.0  ;;  %v3149_v51 = vmax.f32 %v3697_v55, 0.0 }
 0x285   : > { %3167 = vrot.lane.b32.xlu1 %v3144_v48, %s4416_s17  ;;  %v3150_v57 = vmax.f32 %v3698_v53, 0.0  ;;  %v3152_v59 = vmax.f32 %v3702_v58, 0.0 }
 0x288   : > { %3177 = vrot.lane.b32.xlu0 %v3145_v50, %s4416_s17 }
 0x289   : > { %3179 = vrot.lane.b32.xlu1 %v3151_v52, %s4416_s17 }
 0x28c   : > { %3187 = vrot.lane.b32.xlu0 %v3146_v54, %s4416_s17 }
 0x28d   : > { %3169 = vrot.lane.b32.xlu1 %v3150_v57, %s4416_s17 }
 0x290   : > { %3159 = vrot.lane.b32.xlu0 %v3149_v51, %s4416_s17 }
 0x291   : > { %3189 = vrot.lane.b32.xlu1 %v3152_v59, %s4416_s17 }
 0x2f6   : > { %v3158_v3 = vpop.permute.xlu0 %3157 }
 0x2f7   : > { %v3168_v4 = vpop.permute.xlu1 %3167  ;;  %v3163_v11 = vmax.f32 %v3143_v42, %v3158_v3 }
 0x2f8   : > { %v3173_v12 = vmax.f32 %v3144_v48, %v3168_v4 }
 0x2fa   : > { %v3178_v5 = vpop.permute.xlu0 %3177  ;;  %v3205_v26 = vmax.f32 %v3163_v11, %v3173_v12 }
 0x2fb   : > { %v3180_v6 = vpop.permute.xlu1 %3179  ;;  %v3183_v18 = vmax.f32 %v3145_v50, %v3178_v5 }
 0x2fc   : > { %v3184_v22 = vmax.f32 %v3151_v52, %v3180_v6 }
 0x2fe   : > { %v3188_v7 = vpop.permute.xlu0 %3187 }
 0x2ff   : > { %v3170_v8 = vpop.permute.xlu1 %3169  ;;  %v3193_v10 = vmax.f32 %v3146_v54, %v3188_v7 }
 0x300   : > { %v3174_v24 = vmax.f32 %v3150_v57, %v3170_v8 }
 0x301   : > { %v3207_v23 = vmax.f32 %v3183_v18, %v3193_v10 }
 0x302   : > { %v3160_v9 = vpop.permute.xlu0 %3159 }
 0x303   : > { %v3190_v34 = vpop.permute.xlu1 %3189  ;;  %v3164_v19 = vmax.f32 %v3149_v51, %v3160_v9  ;;  %v3211_v29 = vmax.f32 %v3205_v26, %v3207_v23 }
 0x304   : > { %v3194_v20 = vmax.f32 %v3152_v59, %v3190_v34 }
 0x305   : > { %v3206_v15 = vmax.f32 %v3164_v19, %v3174_v24 }
 0x306   : > { %v3208_v27 = vmax.f32 %v3184_v22, %v3194_v20 }
 0x308   : > { %v3212_v32 = vmax.f32 %v3206_v15, %v3208_v27 }
 0x33f   : > { %v3134_v61 = vpop.f32.mrb[4].mxu1 }
 0x340   : > { %v3703_v62 = vadd.f32 %v3134_v61, %v1305_v60  ;;  %v3136_v63 = vpop.f32.mrb[5].mxu1 }
 0x341   : > { %v3138_v0 = vpop.f32.mrb[6].mxu1  ;;  %v3704_v21 = vadd.f32 %v3136_v63, %v1309_v14 }
 0x342   : > { %v3147_v1 = vmax.f32 %v3703_v62, 0.0  ;;  %v3705_v16 = vadd.f32 %v3138_v0, %v1305_v60  ;;  %v3140_v47 = vpop.f32.mrb[7].mxu1 }
 0x343   : > { %v3706_v25 = vadd.f32 %v3140_v47, %v1309_v14  ;;  %v3148_v56 = vmax.f32 %v3704_v21, 0.0 }
 0x344   : > { %v3153_v2 = vmax.f32 %v3705_v16, 0.0  ;;  %3197 = vrot.lane.b32.xlu0 %v3147_v1, %s4416_s17 }
 0x345   : > { %v3154_v13 = vmax.f32 %v3706_v25, 0.0 }
 0x346   : > { %3199 = vrot.lane.b32.xlu1 %v3153_v2, %s4416_s17 }
 0x3b6   : > { %v3198_v39 = vpop.permute.xlu0 %3197 }
 0x3b7   : > { %v3203_v17 = vmax.f32 %v3147_v1, %v3198_v39 }
 0x3b8   : > { %v3200_v28 = vpop.permute.xlu1 %3199 }
 0x3b9   : > { %v3209_v30 = vmax.f32 %v3203_v17, %v3148_v56  ;;  %v3204_v31 = vmax.f32 %v3153_v2, %v3200_v28 }
 0x3bb   : > { %v3213_v33 = vmax.f32 %v3211_v29, %v3209_v30  ;;  %v3210_v35 = vmax.f32 %v3204_v31, %v3154_v13 }
 0x3bd   : > { %3216 = vst.msk [vmem:[%s220_s30] sm:$0xff] %vm3215_vm0, %v3213_v33  ;;  %v3214_v36 = vmax.f32 %v3212_v32, %v3210_v35 }
 0x3bf   : > { %3217 = vst.msk [vmem:[%s220_s30 + $0x8] sm:$0xff] %vm3215_vm0, %v3214_v36 }
 0x3c0   : > { %4365 = shalt.err (!%p4362_p3)
}
 0x3c1   : > { %s4366_s13 = scalar_lea.hbm %s5751_s8, 256  ;;  %s4370_s17 = scalar_lea.hbm %s5803_s5, 512 }
 0x3c2   : > { %p4367_p4 = scmp.ne.s32.totalorder %s5751_s8, %s4366_s13  ;;  %p4371_p9 = scmp.lt.u32.totalorder %s5751_s8, %s5803_s5 }
 0x3c3   : > { %p4372_p10 = scmp.lt.u32.totalorder %s4370_s17, %s4366_s13  ;;  %p4374_p12 = scmp.lt.u32.totalorder %s4366_s13, %s5751_s8 }
 0x3c4   : > { %p4368_p7 = pnand %p4367_p4, %p4488_p5 }
 0x3c5   : > { %p4373_p11 = por %p4372_p10, %p4371_p9 }
 0x3c6   : > { %p4369_p8 = pneg %p4368_p7 }
 0x3c7   : > { %p4375_p13 = por %p4374_p12, %p4373_p11 }
 0x3c9   : > { %p4376_p0 = pnand %p4375_p13, %p4369_p8 }
 0x3cb   : > { %4379 = shalt.err (!%p4376_p0)
}
 0x3cc   : > { %s4418_s15 = smov 128   ;;  %s4419_s30 = smov 8  }
 0x3cd   : > { %3731 = dma.vmem_to_hbm [thread:$0]  (%p4488_p5), %s5753_s6, 256, %s5751_s8, %s5757_s22, %s4418_s15, %s4418_s15, %s4419_s30  }
 0x3ce PF: > { %p3737_p1 = scmp.ge.s32.totalorder %s4414_s21, 2  ;;  %s3247_s23 = sand.u32 1, %s4402_s18  }
 0x3cf   : > { %s3248_s7 = scalar_lea.sflag [#allocation3], %s3247_s23 }
 0x3d0   : > { %p3734_p2 = pnand %p3737_p1, %p4492_p6 }
 0x3d2   : > { %4397 = dma.done.wait (!%p3734_p2), %s3248_s7, 256  }
 0x3d3   : > { %4399 = vsyncadd (!%p3734_p2), %s3248_s7, 4294967040  ;;  %p15_p3 = scmp.ge.s32.totalorder %s4475_s24, 4   ;;  %s5806_s18 = smov %s4406_s19 }
 0x3d4   : > { %s5807_s19 = smov %s4410_s20  ;;  %s5808_s20 = smov %s4486_s27 }
 0x3d5   : > { %s5809_s21 = smov %s4475_s24  ;;  %17 = sbr.rel (!%p15_p3) target bundleno = 3 (0x3), region = 75 }
 0x3dc   :  { %3253 = vsyncpa [#allocation3], 1 }
 0x3dd   :  { %3255 = vsyncpa [#allocation3 + $0x1], 1 }

</bundles_post_ra>
